<compile_context>
chip_gen: v6e
topology: v6e:2x2x1
jax: 0.10.0
libtpu: 0.0.40
codegen_flags: <defaults>
</compile_context>

<pallas_src>
import math

import numpy as np
import jax
import jax.numpy as jnp
from jax.experimental import pallas as pl
from jax.experimental.pallas import tpu as pltpu

_EPS = 1e-5
_VEC_ROWS = 16  # 12 used bias/LN rows, padded to 16 sublanes


def _round_up(x, m):
    return (x + m - 1) // m * m


# ---------------------------------------------------------------------------
# Math helpers (used inside the kernel and by the pure-JAX reference)
# ---------------------------------------------------------------------------
def _layer_norm(x, w, b):
    mu = jnp.mean(x, axis=-1, keepdims=True)
    xc = x - mu
    var = jnp.mean(xc * xc, axis=-1, keepdims=True)
    return xc * jax.lax.rsqrt(var + _EPS) * w + b


def _mha_rows(q_in, k_in, v_in, in_w_t, in_b, out_w_t, out_b, nheads, nbatch):
    """nn.MultiheadAttention (eval, no masks) on batch-flattened rows.

    q_in: (nbatch*Lq, D), k_in/v_in: (nbatch*Lk, D).  Shared q/k or k/v inputs
    (detected by trace-time object identity) are projected with one merged
    full-width matmul.  All heads go through ONE batched rank-3 einsum for the
    score/softmax/context path (heads folded into the leading batch axis).
    """
    d = q_in.shape[-1]
    hd = d // nheads
    scale = 1.0 / math.sqrt(hd)
    rq, rk = q_in.shape[0], k_in.shape[0]
    lq, lk = rq // nbatch, rk // nbatch

    if (q_in is k_in) and (k_in is v_in):
        qkv = jnp.dot(q_in, in_w_t, preferred_element_type=jnp.float32) + in_b
        q, k, v = qkv[:, :d], qkv[:, d:2 * d], qkv[:, 2 * d:]
    elif q_in is k_in:                       # self-attention: q,k share input, v differs
        qk = jnp.dot(q_in, in_w_t[:, :2 * d], preferred_element_type=jnp.float32) + in_b[:, :2 * d]
        q, k = qk[:, :d], qk[:, d:]
        v = jnp.dot(v_in, in_w_t[:, 2 * d:], preferred_element_type=jnp.float32) + in_b[:, 2 * d:]
    elif k_in is v_in:                       # cross-attention: k,v share input (memory)
        q = jnp.dot(q_in, in_w_t[:, :d], preferred_element_type=jnp.float32) + in_b[:, :d]
        kv = jnp.dot(k_in, in_w_t[:, d:], preferred_element_type=jnp.float32) + in_b[:, d:]
        k, v = kv[:, :d], kv[:, d:]
    else:
        q = jnp.dot(q_in, in_w_t[:, :d], preferred_element_type=jnp.float32) + in_b[:, :d]
        k = jnp.dot(k_in, in_w_t[:, d:2 * d], preferred_element_type=jnp.float32) + in_b[:, d:2 * d]
        v = jnp.dot(v_in, in_w_t[:, 2 * d:], preferred_element_type=jnp.float32) + in_b[:, 2 * d:]

    q = q * scale  # scale once, full width (hoisted out of any per-head work)

    def to_heads(x, length):
        # (nbatch*length, d) -> (nheads*nbatch, length, hd), head-major batch axis.
        parts = [x[:, h * hd:(h + 1) * hd] for h in range(nheads)]
        return jnp.concatenate(parts, axis=0).reshape(nheads * nbatch, length, hd)

    qh, kh, vh = to_heads(q, lq), to_heads(k, lk), to_heads(v, lk)

    # ONE batched score / softmax / context per attention (all heads & batch).
    s = jnp.einsum("bqd,bkd->bqk", qh, kh, preferred_element_type=jnp.float32)
    s = s - jnp.max(s, axis=-1, keepdims=True)
    p = jnp.exp(s)
    # exact divide kept: approx reciprocal risks the 2e-4 tolerance check.
    p = p / jnp.sum(p, axis=-1, keepdims=True)
    ctx = jnp.einsum("bqk,bkd->bqd", p, vh, preferred_element_type=jnp.float32)

    ctx = ctx.reshape(nheads, rq, hd)
    ctx_all = jnp.concatenate([ctx[h] for h in range(nheads)], axis=-1)  # (rq, D)
    # single full-width out-projection over all batch rows.
    return jnp.dot(ctx_all, out_w_t, preferred_element_type=jnp.float32) + out_b


# ---------------------------------------------------------------------------
# Kernel body: ONE decoder layer per grid step (layer axis streamed).
# ---------------------------------------------------------------------------
def _make_layer_kernel(nheads, nbatch, d_model, dim_ff):
    D, F = d_model, dim_ff

    def kernel(tgt_ref, mem_ref, qpos_ref,
               sa_in_w_ref, sa_out_w_ref, ca_in_w_ref, ca_out_w_ref,
               lin1_w_ref, lin2_w_ref, vecs_ref,
               norm_w_ref, norm_b_ref, out_ref, x_ref):
        layer = pl.program_id(1)

        @pl.when(layer == 0)
        def _():
            x_ref[...] = tgt_ref[...]       # carried activation init per batch block

        x = x_ref[...]                      # (rows, D), resident in VMEM across layers
        mem = mem_ref[...]                  # (rows_mem, D)
        qpos = qpos_ref[...]                # (rows, D)

        vl = vecs_ref[...]                  # (16, PADW) packed biases + LN params
        sa_in_b, sa_out_b = vl[0:1, :3 * D], vl[1:2, :D]
        ca_in_b, ca_out_b = vl[2:3, :3 * D], vl[3:4, :D]
        lin1_b, lin2_b = vl[4:5, :F], vl[5:6, :D]
        n1_w, n1_b = vl[6:7, :D], vl[7:8, :D]
        n2_w, n2_b = vl[8:9, :D], vl[9:10, :D]
        n3_w, n3_b = vl[10:11, :D], vl[11:12, :D]

        q = x + qpos
        sa = _mha_rows(q, q, x, sa_in_w_ref[...], sa_in_b,
                       sa_out_w_ref[...], sa_out_b, nheads, nbatch)
        x = _layer_norm(x + sa, n1_w, n1_b)

        ca = _mha_rows(x + qpos, mem, mem, ca_in_w_ref[...], ca_in_b,
                       ca_out_w_ref[...], ca_out_b, nheads, nbatch)
        x = _layer_norm(x + ca, n2_w, n2_b)

        ff = jnp.maximum(
            jnp.dot(x, lin1_w_ref[...], preferred_element_type=jnp.float32) + lin1_b, 0.0)
        ff = jnp.dot(ff, lin2_w_ref[...], preferred_element_type=jnp.float32) + lin2_b
        x = _layer_norm(x + ff, n3_w, n3_b)

        x_ref[...] = x                      # carry to next layer

        @pl.when(layer == pl.num_programs(1) - 1)
        def _():
            out_ref[...] = _layer_norm(x, norm_w_ref[...], norm_b_ref[...])

    return kernel


def _pack_layer_params(layer_params, d_model, dim_ff):
    """Stack per-layer weights: 6 matrix stacks + 1 tile-padded bias/LN slab."""
    D, F = d_model, dim_ff
    padw = _round_up(max(3 * D, F, D), 128)   # lane-tile padded slab width

    def stack(name):
        return jnp.stack([p[name] for p in layer_params], axis=0)

    def padded(v):
        return jnp.pad(v, ((0, 0), (0, padw - v.shape[1])))

    vec_names = ("sa_in_b", "sa_out_b", "ca_in_b", "ca_out_b", "lin1_b", "lin2_b",
                 "n1_w", "n1_b", "n2_w", "n2_b", "n3_w", "n3_b")

    def slab(p):
        rows = jnp.concatenate([padded(p[n]) for n in vec_names], axis=0)   # (12, padw)
        return jnp.pad(rows, ((0, _VEC_ROWS - rows.shape[0]), (0, 0)))      # (16, padw)

    vecs = jnp.stack([slab(p) for p in layer_params], axis=0)               # (L, 16, padw)

    packed = (stack("sa_in_w_t"), stack("sa_out_w_t"),
              stack("ca_in_w_t"), stack("ca_out_w_t"),
              stack("lin1_w_t"), stack("lin2_w_t"), vecs)
    return packed, padw


# ---------------------------------------------------------------------------
# TransformerDecoder.forward equivalent (single pallas_call, layer-streamed)
# ---------------------------------------------------------------------------
def transformer_decoder_forward(tgt_qbd, mem_sbd, qpos_qbd, layer_params,
                                norm_w, norm_b, nheads):
    Q, B, D = tgt_qbd.shape
    S = mem_sbd.shape[0]
    F = layer_params[0]["lin1_w_t"].shape[1]
    L = len(layer_params)

    # Parallel batch axis (feeds the 2nd TensorCore on v7x); fall back to one
    # block if the halved row counts would violate the (8,128) block rule.
    BB = 2 if (B % 2 == 0 and ((B // 2) * Q) % 8 == 0 and ((B // 2) * S) % 8 == 0) else 1
    nb = B // BB
    rows_q, rows_m = nb * Q, nb * S

    # seq-major (Q,B,D)/(S,B,D) -> batch-major rows (B*rows, D), once, in the wrapper.
    tgt = jnp.transpose(tgt_qbd, (1, 0, 2)).reshape(B * Q, D)
    mem = jnp.transpose(mem_sbd, (1, 0, 2)).reshape(B * S, D)
    qpos = jnp.transpose(qpos_qbd, (1, 0, 2)).reshape(B * Q, D)

    packed, padw = _pack_layer_params(layer_params, D, F)

    # Per-layer weight blocks: leading (layer) dim squeezed, indexed by the
    # "arbitrary" layer grid axis -> Pallas double-buffers layer l+1 weight DMA
    # behind layer-l compute; only ~2 layers of weights are VMEM-resident.
    w_specs = [
        pl.BlockSpec((None, D, 3 * D), lambda bb, l: (l, 0, 0)),          # sa_in_w
        pl.BlockSpec((None, D, D), lambda bb, l: (l, 0, 0)),              # sa_out_w
        pl.BlockSpec((None, D, 3 * D), lambda bb, l: (l, 0, 0)),          # ca_in_w
        pl.BlockSpec((None, D, D), lambda bb, l: (l, 0, 0)),              # ca_out_w
        pl.BlockSpec((None, D, F), lambda bb, l: (l, 0, 0)),              # lin1_w
        pl.BlockSpec((None, F, D), lambda bb, l: (l, 0, 0)),              # lin2_w
        pl.BlockSpec((None, _VEC_ROWS, padw), lambda bb, l: (l, 0, 0)),   # bias/LN slab
    ]

    # VMEM budget: ~2 buffered copies of one layer's weights + activations +
    # attention/FFN temporaries, with headroom; capped at 48 MiB (v7x has only
    # 64 MiB physical VMEM per TensorCore).
    layer_w_bytes = 4 * (2 * D * 3 * D + 2 * D * D + 2 * D * F + _VEC_ROWS * padw)
    act_bytes = 4 * (rows_q * (6 * D + F) + rows_m * 3 * D
                     + 2 * nheads * nb * Q * max(Q, S))
    vmem_limit = int(min(max(4 * layer_w_bytes + 4 * act_bytes, 8 << 20), 48 << 20))

    out_flat = pl.pallas_call(
        _make_layer_kernel(nheads, nb, D, F),
        out_shape=jax.ShapeDtypeStruct((B * Q, D), jnp.float32),
        grid_spec=pltpu.PrefetchScalarGridSpec(
            num_scalar_prefetch=0,
            grid=(BB, L),                                   # layer axis innermost
            in_specs=[
                pl.BlockSpec((rows_q, D), lambda bb, l: (bb, 0)),   # tgt
                pl.BlockSpec((rows_m, D), lambda bb, l: (bb, 0)),   # memory
                pl.BlockSpec((rows_q, D), lambda bb, l: (bb, 0)),   # query_pos
                *w_specs,
                pl.BlockSpec((1, D), lambda bb, l: (0, 0)),         # final norm w
                pl.BlockSpec((1, D), lambda bb, l: (0, 0)),         # final norm b
            ],
            out_specs=pl.BlockSpec((rows_q, D), lambda bb, l: (bb, 0)),
            scratch_shapes=[pltpu.VMEM((rows_q, D), jnp.float32)],  # carried activation
        ),
        compiler_params=pltpu.CompilerParams(
            dimension_semantics=("parallel", "arbitrary"),
            vmem_limit_bytes=vmem_limit,
        ),
    )(tgt, mem, qpos, *packed, norm_w, norm_b)

    out = out_flat.reshape(B, Q, D)
    return jnp.transpose(out, (1, 0, 2))[None]   # (1, Q, B, D) == output.unsqueeze(0)


# ---------------------------------------------------------------------------
# Pure-JAX reference (structured like PyTorch MHA, for validation)
# ---------------------------------------------------------------------------
def _ref_mha(q_in, k_in, v_in, in_w_t, in_b, out_w_t, out_b, nheads):
    B, Lq, d = q_in.shape
    Lk = k_in.shape[1]
    hd = d // nheads
    q = q_in @ in_w_t[:, :d] + in_b[0, :d]
    k = k_in @ in_w_t[:, d:2 * d] + in_b[0, d:2 * d]
    v = v_in @ in_w_t[:, 2 * d:] + in_b[0, 2 * d:]

    def split(x, Lx):
        return x.reshape(B, Lx, nheads, hd).transpose(0, 2, 1, 3)

    qh, kh, vh = split(q, Lq), split(k, Lk), split(v, Lk)
    s = jnp.einsum("bhqd,bhkd->bhqk", qh, kh) / math.sqrt(hd)
    p = jax.nn.softmax(s, axis=-1)
    ctx = jnp.einsum("bhqk,bhkd->bhqd", p, vh)
    ctx = ctx.transpose(0, 2, 1, 3).reshape(B, Lq, d)
    return ctx @ out_w_t + out_b[0]


def ref_forward(tgt_qbd, mem_sbd, qpos_qbd, layer_params, norm_w, norm_b, nheads):
    tgt = jnp.transpose(tgt_qbd, (1, 0, 2))    # (B, Q, D)
    mem = jnp.transpose(mem_sbd, (1, 0, 2))    # (B, S, D)
    qpos = jnp.transpose(qpos_qbd, (1, 0, 2))  # (B, Q, D)
    out = tgt
    for p in layer_params:
        q = out + qpos
        sa = _ref_mha(q, q, out, p["sa_in_w_t"], p["sa_in_b"],
                      p["sa_out_w_t"], p["sa_out_b"], nheads)
        out = _layer_norm(out + sa, p["n1_w"], p["n1_b"])
        ca = _ref_mha(out + qpos, mem, mem, p["ca_in_w_t"], p["ca_in_b"],
                      p["ca_out_w_t"], p["ca_out_b"], nheads)
        out = _layer_norm(out + ca, p["n2_w"], p["n2_b"])
        ff = jnp.maximum(out @ p["lin1_w_t"] + p["lin1_b"][0], 0.0)
        ff = ff @ p["lin2_w_t"] + p["lin2_b"][0]
        out = _layer_norm(out + ff, p["n3_w"], p["n3_b"])
    out = _layer_norm(out, norm_w, norm_b)
    return jnp.transpose(out, (1, 0, 2))[None]


# ---------------------------------------------------------------------------
# Deterministic parameter init (shapes follow DETR TransformerDecoderLayer)
# ---------------------------------------------------------------------------
def init_layer_params(key, d_model, dim_ff):
    ks = jax.random.split(key, 12)

    def rnd(k, shape, s=0.05):
        return (s * jax.random.normal(k, shape)).astype(jnp.float32)

    D, F = d_model, dim_ff
    return {
        "sa_in_w_t": rnd(ks[0], (D, 3 * D)), "sa_in_b": rnd(ks[1], (1, 3 * D), 0.01),
        "sa_out_w_t": rnd(ks[2], (D, D)), "sa_out_b": rnd(ks[3], (1, D), 0.01),
        "ca_in_w_t": rnd(ks[4], (D, 3 * D)), "ca_in_b": rnd(ks[5], (1, 3 * D), 0.01),
        "ca_out_w_t": rnd(ks[6], (D, D)), "ca_out_b": rnd(ks[7], (1, D), 0.01),
        "lin1_w_t": rnd(ks[8], (D, F)), "lin1_b": rnd(ks[9], (1, F), 0.01),
        "lin2_w_t": rnd(ks[10], (F, D)), "lin2_b": rnd(ks[11], (1, D), 0.01),
        "n1_w": jnp.ones((1, D), jnp.float32), "n1_b": jnp.zeros((1, D), jnp.float32),
        "n2_w": jnp.ones((1, D), jnp.float32), "n2_b": jnp.zeros((1, D), jnp.float32),
        "n3_w": jnp.ones((1, D), jnp.float32), "n3_b": jnp.zeros((1, D), jnp.float32),
    }


if __name__ == "__main__":
    Q, B, S, D, H, F_FF = 8, 2, 16, 32, 4, 64
    NUM_LAYERS = 2

    key = jax.random.PRNGKey(0)
    k_tgt, k_mem, k_pos, k_par = jax.random.split(key, 4)
    tgt = jax.random.normal(k_tgt, (Q, B, D), jnp.float32)      # (Q, B, D)
    mem = jax.random.normal(k_mem, (S, B, D), jnp.float32)      # (S, B, D)
    qpos = jax.random.normal(k_pos, (Q, B, D), jnp.float32)     # (Q, B, D)

    layer_keys = jax.random.split(k_par, NUM_LAYERS)
    layer_params = [init_layer_params(layer_keys[i], D, F_FF) for i in range(NUM_LAYERS)]
    norm_w = jnp.ones((1, D), jnp.float32)
    norm_b = jnp.zeros((1, D), jnp.float32)

    out = transformer_decoder_forward(tgt, mem, qpos, layer_params, norm_w, norm_b, H)
    out = jax.block_until_ready(out)

    ref = jax.block_until_ready(
        ref_forward(tgt, mem, qpos, layer_params, norm_w, norm_b, H))

    assert out.shape == (1, Q, B, D), out.shape
    np.testing.assert_allclose(np.asarray(out), np.asarray(ref), rtol=2e-4, atol=2e-4)
    print("KERNEL_OK")
</pallas_src>

<mosaic_0001>
module attributes {stable_mosaic.version = 11 : i64} {
  func.func @kernel(%arg0: i32, %arg1: i32, %arg2: memref<8x32xf32, #tpu.memory_space<vmem>>, %arg3: memref<16x32xf32, #tpu.memory_space<vmem>>, %arg4: memref<8x32xf32, #tpu.memory_space<vmem>>, %arg5: memref<1x32x96xf32, #tpu.memory_space<vmem>>, %arg6: memref<1x32x32xf32, #tpu.memory_space<vmem>>, %arg7: memref<1x32x96xf32, #tpu.memory_space<vmem>>, %arg8: memref<1x32x32xf32, #tpu.memory_space<vmem>>, %arg9: memref<1x32x64xf32, #tpu.memory_space<vmem>>, %arg10: memref<1x64x32xf32, #tpu.memory_space<vmem>>, %arg11: memref<1x16x128xf32, #tpu.memory_space<vmem>>, %arg12: memref<1x32xf32, #tpu.memory_space<vmem>>, %arg13: memref<1x32xf32, #tpu.memory_space<vmem>>, %arg14: memref<8x32xf32, #tpu.memory_space<vmem>>, %arg15: memref<8x32xf32, #tpu.memory_space<vmem>>) attributes {dimension_semantics = [#tpu.dimension_semantics<parallel>, #tpu.dimension_semantics<arbitrary>], iteration_bounds = array<i64: 2, 2>, scalar_prefetch = 0 : i64, scratch_operands = 1 : i64, tpu.core_type = #tpu.core_type<tc>, window_params = [{transform_indices = @transform_0, window_bounds = array<i64: 8, 32>}, {transform_indices = @transform_1, window_bounds = array<i64: 16, 32>}, {transform_indices = @transform_2, window_bounds = array<i64: 8, 32>}, {transform_indices = @transform_3, window_bounds = array<i64: 1, 32, 96>}, {transform_indices = @transform_4, window_bounds = array<i64: 1, 32, 32>}, {transform_indices = @transform_5, window_bounds = array<i64: 1, 32, 96>}, {transform_indices = @transform_6, window_bounds = array<i64: 1, 32, 32>}, {transform_indices = @transform_7, window_bounds = array<i64: 1, 32, 64>}, {transform_indices = @transform_8, window_bounds = array<i64: 1, 64, 32>}, {transform_indices = @transform_9, window_bounds = array<i64: 1, 16, 128>}, {pipeline_mode = #tpu.pipeline_mode<synchronous>, transform_indices = @transform_10, window_bounds = array<i64: 1, 32>}, {pipeline_mode = #tpu.pipeline_mode<synchronous>, transform_indices = @transform_11, window_bounds = array<i64: 1, 32>}, {transform_indices = @transform_12, window_bounds = array<i64: 8, 32>}]} {
    %c0_i32 = arith.constant 0 : i32
    %0 = arith.cmpi eq, %arg1, %c0_i32 : i32
    %1 = arith.extui %0 : i1 to i32
    %c0_i32_0 = arith.constant 0 : i32
    %2 = arith.cmpi ne, %1, %c0_i32_0 : i32
    scf.if %2 {
      %c0_63 = arith.constant 0 : index
      %c0_64 = arith.constant 0 : index
      %219 = vector.load %arg2[%c0_63, %c0_64] : memref<8x32xf32, #tpu.memory_space<vmem>>, vector<8x32xf32>
      %c0_65 = arith.constant 0 : index
      %c0_66 = arith.constant 0 : index
      %220 = vector.load %arg15[%c0_65, %c0_66] : memref<8x32xf32, #tpu.memory_space<vmem>>, vector<8x32xf32>
      tpu.vector_store %arg15[%c0_65, %c0_66], %219 {strides = array<i32>} : memref<8x32xf32, #tpu.memory_space<vmem>>, vector<8x32xf32>,
    } else {
    }
    %c0 = arith.constant 0 : index
    %c0_1 = arith.constant 0 : index
    %3 = vector.load %arg15[%c0, %c0_1] : memref<8x32xf32, #tpu.memory_space<vmem>>, vector<8x32xf32>
    %c0_2 = arith.constant 0 : index
    %c0_3 = arith.constant 0 : index
    %4 = vector.load %arg3[%c0_2, %c0_3] : memref<16x32xf32, #tpu.memory_space<vmem>>, vector<16x32xf32>
    %c0_4 = arith.constant 0 : index
    %c0_5 = arith.constant 0 : index
    %5 = vector.load %arg4[%c0_4, %c0_5] : memref<8x32xf32, #tpu.memory_space<vmem>>, vector<8x32xf32>
    %c0_6 = arith.constant 0 : index
    %c0_7 = arith.constant 0 : index
    %c0_8 = arith.constant 0 : index
    %6 = vector.load %arg11[%c0_6, %c0_7, %c0_8] : memref<1x16x128xf32, #tpu.memory_space<vmem>>, vector<1x16x128xf32>
    %7 = vector.shape_cast %6 : vector<1x16x128xf32> to vector<16x128xf32>
    %8 = vector.extract_strided_slice %7 {offsets = [0, 0], sizes = [1, 96], strides = [1, 1]} : vector<16x128xf32> to vector<1x96xf32>
    %9 = vector.extract_strided_slice %7 {offsets = [1, 0], sizes = [1, 32], strides = [1, 1]} : vector<16x128xf32> to vector<1x32xf32>
    %10 = vector.extract_strided_slice %7 {offsets = [2, 0], sizes = [1, 96], strides = [1, 1]} : vector<16x128xf32> to vector<1x96xf32>
    %11 = vector.extract_strided_slice %7 {offsets = [3, 0], sizes = [1, 32], strides = [1, 1]} : vector<16x128xf32> to vector<1x32xf32>
    %12 = vector.extract_strided_slice %7 {offsets = [4, 0], sizes = [1, 64], strides = [1, 1]} : vector<16x128xf32> to vector<1x64xf32>
    %13 = vector.extract_strided_slice %7 {offsets = [5, 0], sizes = [1, 32], strides = [1, 1]} : vector<16x128xf32> to vector<1x32xf32>
    %14 = vector.extract_strided_slice %7 {offsets = [6, 0], sizes = [1, 32], strides = [1, 1]} : vector<16x128xf32> to vector<1x32xf32>
    %15 = vector.extract_strided_slice %7 {offsets = [7, 0], sizes = [1, 32], strides = [1, 1]} : vector<16x128xf32> to vector<1x32xf32>
    %16 = vector.extract_strided_slice %7 {offsets = [8, 0], sizes = [1, 32], strides = [1, 1]} : vector<16x128xf32> to vector<1x32xf32>
    %17 = vector.extract_strided_slice %7 {offsets = [9, 0], sizes = [1, 32], strides = [1, 1]} : vector<16x128xf32> to vector<1x32xf32>
    %18 = vector.extract_strided_slice %7 {offsets = [10, 0], sizes = [1, 32], strides = [1, 1]} : vector<16x128xf32> to vector<1x32xf32>
    %19 = vector.extract_strided_slice %7 {offsets = [11, 0], sizes = [1, 32], strides = [1, 1]} : vector<16x128xf32> to vector<1x32xf32>
    %20 = arith.addf %3, %5 : vector<8x32xf32>
    %c0_9 = arith.constant 0 : index
    %c0_10 = arith.constant 0 : index
    %c0_11 = arith.constant 0 : index
    %21 = vector.load %arg5[%c0_9, %c0_10, %c0_11] : memref<1x32x96xf32, #tpu.memory_space<vmem>>, vector<1x32x96xf32>
    %22 = vector.shape_cast %21 : vector<1x32x96xf32> to vector<32x96xf32>
    %c0_12 = arith.constant 0 : index
    %c0_13 = arith.constant 0 : index
    %c0_14 = arith.constant 0 : index
    %23 = vector.load %arg6[%c0_12, %c0_13, %c0_14] : memref<1x32x32xf32, #tpu.memory_space<vmem>>, vector<1x32x32xf32>
    %24 = vector.shape_cast %23 : vector<1x32x32xf32> to vector<32x32xf32>
    %25 = vector.extract_strided_slice %22 {offsets = [0, 0], sizes = [32, 64], strides = [1, 1]} : vector<32x96xf32> to vector<32x64xf32>
    %cst = arith.constant dense<0.000000e+00> : vector<8x64xf32>
    %26 = tpu.matmul %20, %25, %cst {dimension_numbers = #tpu.dot_dimension_numbers<[1], [0], [0], [1], [0, 0, 1, 1], [], []>} : vector<8x32xf32>, vector<32x64xf32>, vector<8x64xf32> -> vector<8x64xf32>
    %27 = vector.extract_strided_slice %8 {offsets = [0, 0], sizes = [1, 64], strides = [1, 1]} : vector<1x96xf32> to vector<1x64xf32>
    %28 = vector.broadcast %27 : vector<1x64xf32> to vector<8x64xf32>
    %29 = arith.addf %26, %28 : vector<8x64xf32>
    %30 = vector.extract_strided_slice %29 {offsets = [0, 0], sizes = [8, 32], strides = [1, 1]} : vector<8x64xf32> to vector<8x32xf32>
    %31 = vector.extract_strided_slice %29 {offsets = [0, 32], sizes = [8, 32], strides = [1, 1]} : vector<8x64xf32> to vector<8x32xf32>
    %32 = vector.extract_strided_slice %22 {offsets = [0, 64], sizes = [32, 32], strides = [1, 1]} : vector<32x96xf32> to vector<32x32xf32>
    %cst_15 = arith.constant dense<0.000000e+00> : vector<8x32xf32>
    %33 = tpu.matmul %3, %32, %cst_15 {dimension_numbers = #tpu.dot_dimension_numbers<[1], [0], [0], [1], [0, 0, 1, 1], [], []>} : vector<8x32xf32>, vector<32x32xf32>, vector<8x32xf32> -> vector<8x32xf32>
    %34 = vector.extract_strided_slice %8 {offsets = [0, 64], sizes = [1, 32], strides = [1, 1]} : vector<1x96xf32> to vector<1x32xf32>
    %35 = vector.broadcast %34 : vector<1x32xf32> to vector<8x32xf32>
    %36 = arith.addf %33, %35 : vector<8x32xf32>
    %cst_16 = arith.constant 0.353553385 : f32
    %37 = vector.broadcast %cst_16 : f32 to vector<8x32xf32>
    %38 = arith.mulf %30, %37 : vector<8x32xf32>
    %39 = vector.extract_strided_slice %38 {offsets = [0, 0], sizes = [8, 8], strides = [1, 1]} : vector<8x32xf32> to vector<8x8xf32>
    %40 = vector.extract_strided_slice %38 {offsets = [0, 8], sizes = [8, 8], strides = [1, 1]} : vector<8x32xf32> to vector<8x8xf32>
    %41 = vector.extract_strided_slice %38 {offsets = [0, 16], sizes = [8, 8], strides = [1, 1]} : vector<8x32xf32> to vector<8x8xf32>
    %42 = vector.extract_strided_slice %38 {offsets = [0, 24], sizes = [8, 8], strides = [1, 1]} : vector<8x32xf32> to vector<8x8xf32>
    %43 = tpu.concatenate %39, %40, %41, %42 in 0 : vector<8x8xf32>, vector<8x8xf32>, vector<8x8xf32>, vector<8x8xf32> -> vector<32x8xf32>
    %44 = vector.shape_cast %43 : vector<32x8xf32> to vector<4x8x8xf32>
    %45 = vector.extract_strided_slice %31 {offsets = [0, 0], sizes = [8, 8], strides = [1, 1]} : vector<8x32xf32> to vector<8x8xf32>
    %46 = vector.extract_strided_slice %31 {offsets = [0, 8], sizes = [8, 8], strides = [1, 1]} : vector<8x32xf32> to vector<8x8xf32>
    %47 = vector.extract_strided_slice %31 {offsets = [0, 16], sizes = [8, 8], strides = [1, 1]} : vector<8x32xf32> to vector<8x8xf32>
    %48 = vector.extract_strided_slice %31 {offsets = [0, 24], sizes = [8, 8], strides = [1, 1]} : vector<8x32xf32> to vector<8x8xf32>
    %49 = tpu.concatenate %45, %46, %47, %48 in 0 : vector<8x8xf32>, vector<8x8xf32>, vector<8x8xf32>, vector<8x8xf32> -> vector<32x8xf32>
    %50 = vector.shape_cast %49 : vector<32x8xf32> to vector<4x8x8xf32>
    %51 = vector.extract_strided_slice %36 {offsets = [0, 0], sizes = [8, 8], strides = [1, 1]} : vector<8x32xf32> to vector<8x8xf32>
    %52 = vector.extract_strided_slice %36 {offsets = [0, 8], sizes = [8, 8], strides = [1, 1]} : vector<8x32xf32> to vector<8x8xf32>
    %53 = vector.extract_strided_slice %36 {offsets = [0, 16], sizes = [8, 8], strides = [1, 1]} : vector<8x32xf32> to vector<8x8xf32>
    %54 = vector.extract_strided_slice %36 {offsets = [0, 24], sizes = [8, 8], strides = [1, 1]} : vector<8x32xf32> to vector<8x8xf32>
    %55 = tpu.concatenate %51, %52, %53, %54 in 0 : vector<8x8xf32>, vector<8x8xf32>, vector<8x8xf32>, vector<8x8xf32> -> vector<32x8xf32>
    %56 = vector.shape_cast %55 : vector<32x8xf32> to vector<4x8x8xf32>
    "tpu.trace_start"() <{level = 10 : i32, message = "bqd,bkd->bqk"}> : () -> ()
    %cst_17 = arith.constant dense<0.000000e+00> : vector<4x8x8xf32>
    %57 = tpu.matmul %44, %50, %cst_17 {dimension_numbers = #tpu.dot_dimension_numbers<[2], [2], [1], [1], [0, 0, 0, 1, 1, 1], [0], [0]>} : vector<4x8x8xf32>, vector<4x8x8xf32>, vector<4x8x8xf32> -> vector<4x8x8xf32>
    "tpu.trace_stop"() : () -> ()
    %cst_18 = arith.constant dense<0xFF800000> : vector<4x8xf32>
    %58 = vector.multi_reduction <maximumf>, %57, %cst_18 [2] : vector<4x8x8xf32> to vector<4x8xf32>
    %59 = vector.shape_cast %58 : vector<4x8xf32> to vector<4x8x1xf32>
    %60 = vector.broadcast %59 : vector<4x8x1xf32> to vector<4x8x8xf32>
    %61 = arith.subf %57, %60 : vector<4x8x8xf32>
    %62 = math.exp %61 : vector<4x8x8xf32>
    %cst_19 = arith.constant dense<0.000000e+00> : vector<4x8xf32>
    %63 = vector.multi_reduction <add>, %62, %cst_19 [2] : vector<4x8x8xf32> to vector<4x8xf32>
    %64 = vector.shape_cast %63 : vector<4x8xf32> to vector<4x8x1xf32>
    %65 = vector.broadcast %64 : vector<4x8x1xf32> to vector<4x8x8xf32>
    %66 = arith.divf %62, %65 : vector<4x8x8xf32>
    "tpu.trace_start"() <{level = 10 : i32, message = "bqk,bkd->bqd"}> : () -> ()
    %cst_20 = arith.constant dense<0.000000e+00> : vector<4x8x8xf32>
    %67 = tpu.matmul %66, %56, %cst_20 {dimension_numbers = #tpu.dot_dimension_numbers<[2], [1], [1], [2], [0, 0, 0, 1, 1, 2], [0], [0]>} : vector<4x8x8xf32>, vector<4x8x8xf32>, vector<4x8x8xf32> -> vector<4x8x8xf32>
    "tpu.trace_stop"() : () -> ()
    %68 = vector.extract_strided_slice %67 {offsets = [0, 0, 0], sizes = [1, 8, 8], strides = [1, 1, 1]} : vector<4x8x8xf32> to vector<1x8x8xf32>
    %69 = vector.shape_cast %68 : vector<1x8x8xf32> to vector<8x8xf32>
    %70 = vector.extract_strided_slice %67 {offsets = [1, 0, 0], sizes = [1, 8, 8], strides = [1, 1, 1]} : vector<4x8x8xf32> to vector<1x8x8xf32>
    %71 = vector.shape_cast %70 : vector<1x8x8xf32> to vector<8x8xf32>
    %72 = vector.extract_strided_slice %67 {offsets = [2, 0, 0], sizes = [1, 8, 8], strides = [1, 1, 1]} : vector<4x8x8xf32> to vector<1x8x8xf32>
    %73 = vector.shape_cast %72 : vector<1x8x8xf32> to vector<8x8xf32>
    %74 = vector.extract_strided_slice %67 {offsets = [3, 0, 0], sizes = [1, 8, 8], strides = [1, 1, 1]} : vector<4x8x8xf32> to vector<1x8x8xf32>
    %75 = vector.shape_cast %74 : vector<1x8x8xf32> to vector<8x8xf32>
    %76 = tpu.concatenate %69, %71, %73, %75 in 1 : vector<8x8xf32>, vector<8x8xf32>, vector<8x8xf32>, vector<8x8xf32> -> vector<8x32xf32>
    %cst_21 = arith.constant dense<0.000000e+00> : vector<8x32xf32>
    %77 = tpu.matmul %76, %24, %cst_21 {dimension_numbers = #tpu.dot_dimension_numbers<[1], [0], [0], [1], [0, 0, 1, 1], [], []>} : vector<8x32xf32>, vector<32x32xf32>, vector<8x32xf32> -> vector<8x32xf32>
    %78 = vector.broadcast %9 : vector<1x32xf32> to vector<8x32xf32>
    %79 = arith.addf %77, %78 : vector<8x32xf32>
    %80 = arith.addf %3, %79 : vector<8x32xf32>
    %cst_22 = arith.constant dense<0.000000e+00> : vector<8xf32>
    %81 = vector.multi_reduction <add>, %80, %cst_22 [1] : vector<8x32xf32> to vector<8xf32>
    %82 = vector.shape_cast %81 : vector<8xf32> to vector<8x1xf32>
    %cst_23 = arith.constant 3.200000e+01 : f32
    %83 = vector.broadcast %cst_23 : f32 to vector<8x1xf32>
    %84 = arith.divf %82, %83 : vector<8x1xf32>
    %85 = vector.broadcast %84 : vector<8x1xf32> to vector<8x32xf32>
    %86 = arith.subf %80, %85 : vector<8x32xf32>
    %87 = arith.mulf %86, %86 : vector<8x32xf32>
    %cst_24 = arith.constant dense<0.000000e+00> : vector<8xf32>
    %88 = vector.multi_reduction <add>, %87, %cst_24 [1] : vector<8x32xf32> to vector<8xf32>
    %89 = vector.shape_cast %88 : vector<8xf32> to vector<8x1xf32>
    %cst_25 = arith.constant 3.200000e+01 : f32
    %90 = vector.broadcast %cst_25 : f32 to vector<8x1xf32>
    %91 = arith.divf %89, %90 : vector<8x1xf32>
    %cst_26 = arith.constant 9.99999974E-6 : f32
    %92 = vector.broadcast %cst_26 : f32 to vector<8x1xf32>
    %93 = arith.addf %91, %92 : vector<8x1xf32>
    %94 = math.rsqrt %93 : vector<8x1xf32>
    %95 = vector.broadcast %94 : vector<8x1xf32> to vector<8x32xf32>
    %96 = arith.mulf %86, %95 : vector<8x32xf32>
    %97 = vector.broadcast %14 : vector<1x32xf32> to vector<8x32xf32>
    %98 = arith.mulf %96, %97 : vector<8x32xf32>
    %99 = vector.broadcast %15 : vector<1x32xf32> to vector<8x32xf32>
    %100 = arith.addf %98, %99 : vector<8x32xf32>
    %101 = arith.addf %100, %5 : vector<8x32xf32>
    %c0_27 = arith.constant 0 : index
    %c0_28 = arith.constant 0 : index
    %c0_29 = arith.constant 0 : index
    %102 = vector.load %arg7[%c0_27, %c0_28, %c0_29] : memref<1x32x96xf32, #tpu.memory_space<vmem>>, vector<1x32x96xf32>
    %103 = vector.shape_cast %102 : vector<1x32x96xf32> to vector<32x96xf32>
    %c0_30 = arith.constant 0 : index
    %c0_31 = arith.constant 0 : index
    %c0_32 = arith.constant 0 : index
    %104 = vector.load %arg8[%c0_30, %c0_31, %c0_32] : memref<1x32x32xf32, #tpu.memory_space<vmem>>, vector<1x32x32xf32>
    %105 = vector.shape_cast %104 : vector<1x32x32xf32> to vector<32x32xf32>
    %106 = vector.extract_strided_slice %103 {offsets = [0, 0], sizes = [32, 32], strides = [1, 1]} : vector<32x96xf32> to vector<32x32xf32>
    %cst_33 = arith.constant dense<0.000000e+00> : vector<8x32xf32>
    %107 = tpu.matmul %101, %106, %cst_33 {dimension_numbers = #tpu.dot_dimension_numbers<[1], [0], [0], [1], [0, 0, 1, 1], [], []>} : vector<8x32xf32>, vector<32x32xf32>, vector<8x32xf32> -> vector<8x32xf32>
    %108 = vector.extract_strided_slice %10 {offsets = [0, 0], sizes = [1, 32], strides = [1, 1]} : vector<1x96xf32> to vector<1x32xf32>
    %109 = vector.broadcast %108 : vector<1x32xf32> to vector<8x32xf32>
    %110 = arith.addf %107, %109 : vector<8x32xf32>
    %111 = vector.extract_strided_slice %103 {offsets = [0, 32], sizes = [32, 64], strides = [1, 1]} : vector<32x96xf32> to vector<32x64xf32>
    %cst_34 = arith.constant dense<0.000000e+00> : vector<16x64xf32>
    %112 = tpu.matmul %4, %111, %cst_34 {dimension_numbers = #tpu.dot_dimension_numbers<[1], [0], [0], [1], [0, 0, 1, 1], [], []>} : vector<16x32xf32>, vector<32x64xf32>, vector<16x64xf32> -> vector<16x64xf32>
    %113 = vector.extract_strided_slice %10 {offsets = [0, 32], sizes = [1, 64], strides = [1, 1]} : vector<1x96xf32> to vector<1x64xf32>
    %114 = vector.broadcast %113 : vector<1x64xf32> to vector<16x64xf32>
    %115 = arith.addf %112, %114 : vector<16x64xf32>
    %116 = vector.extract_strided_slice %115 {offsets = [0, 0], sizes = [16, 32], strides = [1, 1]} : vector<16x64xf32> to vector<16x32xf32>
    %117 = vector.extract_strided_slice %115 {offsets = [0, 32], sizes = [16, 32], strides = [1, 1]} : vector<16x64xf32> to vector<16x32xf32>
    %cst_35 = arith.constant 0.353553385 : f32
    %118 = vector.broadcast %cst_35 : f32 to vector<8x32xf32>
    %119 = arith.mulf %110, %118 : vector<8x32xf32>
    %120 = vector.extract_strided_slice %119 {offsets = [0, 0], sizes = [8, 8], strides = [1, 1]} : vector<8x32xf32> to vector<8x8xf32>
    %121 = vector.extract_strided_slice %119 {offsets = [0, 8], sizes = [8, 8], strides = [1, 1]} : vector<8x32xf32> to vector<8x8xf32>
    %122 = vector.extract_strided_slice %119 {offsets = [0, 16], sizes = [8, 8], strides = [1, 1]} : vector<8x32xf32> to vector<8x8xf32>
    %123 = vector.extract_strided_slice %119 {offsets = [0, 24], sizes = [8, 8], strides = [1, 1]} : vector<8x32xf32> to vector<8x8xf32>
    %124 = tpu.concatenate %120, %121, %122, %123 in 0 : vector<8x8xf32>, vector<8x8xf32>, vector<8x8xf32>, vector<8x8xf32> -> vector<32x8xf32>
    %125 = vector.shape_cast %124 : vector<32x8xf32> to vector<4x8x8xf32>
    %126 = vector.extract_strided_slice %116 {offsets = [0, 0], sizes = [16, 8], strides = [1, 1]} : vector<16x32xf32> to vector<16x8xf32>
    %127 = vector.extract_strided_slice %116 {offsets = [0, 8], sizes = [16, 8], strides = [1, 1]} : vector<16x32xf32> to vector<16x8xf32>
    %128 = vector.extract_strided_slice %116 {offsets = [0, 16], sizes = [16, 8], strides = [1, 1]} : vector<16x32xf32> to vector<16x8xf32>
    %129 = vector.extract_strided_slice %116 {offsets = [0, 24], sizes = [16, 8], strides = [1, 1]} : vector<16x32xf32> to vector<16x8xf32>
    %130 = tpu.concatenate %126, %127, %128, %129 in 0 : vector<16x8xf32>, vector<16x8xf32>, vector<16x8xf32>, vector<16x8xf32> -> vector<64x8xf32>
    %131 = vector.shape_cast %130 : vector<64x8xf32> to vector<4x16x8xf32>
    %132 = vector.extract_strided_slice %117 {offsets = [0, 0], sizes = [16, 8], strides = [1, 1]} : vector<16x32xf32> to vector<16x8xf32>
    %133 = vector.extract_strided_slice %117 {offsets = [0, 8], sizes = [16, 8], strides = [1, 1]} : vector<16x32xf32> to vector<16x8xf32>
    %134 = vector.extract_strided_slice %117 {offsets = [0, 16], sizes = [16, 8], strides = [1, 1]} : vector<16x32xf32> to vector<16x8xf32>
    %135 = vector.extract_strided_slice %117 {offsets = [0, 24], sizes = [16, 8], strides = [1, 1]} : vector<16x32xf32> to vector<16x8xf32>
    %136 = tpu.concatenate %132, %133, %134, %135 in 0 : vector<16x8xf32>, vector<16x8xf32>, vector<16x8xf32>, vector<16x8xf32> -> vector<64x8xf32>
    %137 = vector.shape_cast %136 : vector<64x8xf32> to vector<4x16x8xf32>
    "tpu.trace_start"() <{level = 10 : i32, message = "bqd,bkd->bqk"}> : () -> ()
    %cst_36 = arith.constant dense<0.000000e+00> : vector<4x8x16xf32>
    %138 = tpu.matmul %125, %131, %cst_36 {dimension_numbers = #tpu.dot_dimension_numbers<[2], [2], [1], [1], [0, 0, 0, 1, 1, 1], [0], [0]>} : vector<4x8x8xf32>, vector<4x16x8xf32>, vector<4x8x16xf32> -> vector<4x8x16xf32>
    "tpu.trace_stop"() : () -> ()
    %cst_37 = arith.constant dense<0xFF800000> : vector<4x8xf32>
    %139 = vector.multi_reduction <maximumf>, %138, %cst_37 [2] : vector<4x8x16xf32> to vector<4x8xf32>
    %140 = vector.shape_cast %139 : vector<4x8xf32> to vector<4x8x1xf32>
    %141 = vector.broadcast %140 : vector<4x8x1xf32> to vector<4x8x16xf32>
    %142 = arith.subf %138, %141 : vector<4x8x16xf32>
    %143 = math.exp %142 : vector<4x8x16xf32>
    %cst_38 = arith.constant dense<0.000000e+00> : vector<4x8xf32>
    %144 = vector.multi_reduction <add>, %143, %cst_38 [2] : vector<4x8x16xf32> to vector<4x8xf32>
    %145 = vector.shape_cast %144 : vector<4x8xf32> to vector<4x8x1xf32>
    %146 = vector.broadcast %145 : vector<4x8x1xf32> to vector<4x8x16xf32>
    %147 = arith.divf %143, %146 : vector<4x8x16xf32>
    "tpu.trace_start"() <{level = 10 : i32, message = "bqk,bkd->bqd"}> : () -> ()
    %cst_39 = arith.constant dense<0.000000e+00> : vector<4x8x8xf32>
    %148 = tpu.matmul %147, %137, %cst_39 {dimension_numbers = #tpu.dot_dimension_numbers<[2], [1], [1], [2], [0, 0, 0, 1, 1, 2], [0], [0]>} : vector<4x8x16xf32>, vector<4x16x8xf32>, vector<4x8x8xf32> -> vector<4x8x8xf32>
    "tpu.trace_stop"() : () -> ()
    %149 = vector.extract_strided_slice %148 {offsets = [0, 0, 0], sizes = [1, 8, 8], strides = [1, 1, 1]} : vector<4x8x8xf32> to vector<1x8x8xf32>
    %150 = vector.shape_cast %149 : vector<1x8x8xf32> to vector<8x8xf32>
    %151 = vector.extract_strided_slice %148 {offsets = [1, 0, 0], sizes = [1, 8, 8], strides = [1, 1, 1]} : vector<4x8x8xf32> to vector<1x8x8xf32>
    %152 = vector.shape_cast %151 : vector<1x8x8xf32> to vector<8x8xf32>
    %153 = vector.extract_strided_slice %148 {offsets = [2, 0, 0], sizes = [1, 8, 8], strides = [1, 1, 1]} : vector<4x8x8xf32> to vector<1x8x8xf32>
    %154 = vector.shape_cast %153 : vector<1x8x8xf32> to vector<8x8xf32>
    %155 = vector.extract_strided_slice %148 {offsets = [3, 0, 0], sizes = [1, 8, 8], strides = [1, 1, 1]} : vector<4x8x8xf32> to vector<1x8x8xf32>
    %156 = vector.shape_cast %155 : vector<1x8x8xf32> to vector<8x8xf32>
    %157 = tpu.concatenate %150, %152, %154, %156 in 1 : vector<8x8xf32>, vector<8x8xf32>, vector<8x8xf32>, vector<8x8xf32> -> vector<8x32xf32>
    %cst_40 = arith.constant dense<0.000000e+00> : vector<8x32xf32>
    %158 = tpu.matmul %157, %105, %cst_40 {dimension_numbers = #tpu.dot_dimension_numbers<[1], [0], [0], [1], [0, 0, 1, 1], [], []>} : vector<8x32xf32>, vector<32x32xf32>, vector<8x32xf32> -> vector<8x32xf32>
    %159 = vector.broadcast %11 : vector<1x32xf32> to vector<8x32xf32>
    %160 = arith.addf %158, %159 : vector<8x32xf32>
    %161 = arith.addf %100, %160 : vector<8x32xf32>
    %cst_41 = arith.constant dense<0.000000e+00> : vector<8xf32>
    %162 = vector.multi_reduction <add>, %161, %cst_41 [1] : vector<8x32xf32> to vector<8xf32>
    %163 = vector.shape_cast %162 : vector<8xf32> to vector<8x1xf32>
    %cst_42 = arith.constant 3.200000e+01 : f32
    %164 = vector.broadcast %cst_42 : f32 to vector<8x1xf32>
    %165 = arith.divf %163, %164 : vector<8x1xf32>
    %166 = vector.broadcast %165 : vector<8x1xf32> to vector<8x32xf32>
    %167 = arith.subf %161, %166 : vector<8x32xf32>
    %168 = arith.mulf %167, %167 : vector<8x32xf32>
    %cst_43 = arith.constant dense<0.000000e+00> : vector<8xf32>
    %169 = vector.multi_reduction <add>, %168, %cst_43 [1] : vector<8x32xf32> to vector<8xf32>
    %170 = vector.shape_cast %169 : vector<8xf32> to vector<8x1xf32>
    %cst_44 = arith.constant 3.200000e+01 : f32
    %171 = vector.broadcast %cst_44 : f32 to vector<8x1xf32>
    %172 = arith.divf %170, %171 : vector<8x1xf32>
    %cst_45 = arith.constant 9.99999974E-6 : f32
    %173 = vector.broadcast %cst_45 : f32 to vector<8x1xf32>
    %174 = arith.addf %172, %173 : vector<8x1xf32>
    %175 = math.rsqrt %174 : vector<8x1xf32>
    %176 = vector.broadcast %175 : vector<8x1xf32> to vector<8x32xf32>
    %177 = arith.mulf %167, %176 : vector<8x32xf32>
    %178 = vector.broadcast %16 : vector<1x32xf32> to vector<8x32xf32>
    %179 = arith.mulf %177, %178 : vector<8x32xf32>
    %180 = vector.broadcast %17 : vector<1x32xf32> to vector<8x32xf32>
    %181 = arith.addf %179, %180 : vector<8x32xf32>
    %c0_46 = arith.constant 0 : index
    %c0_47 = arith.constant 0 : index
    %c0_48 = arith.constant 0 : index
    %182 = vector.load %arg9[%c0_46, %c0_47, %c0_48] : memref<1x32x64xf32, #tpu.memory_space<vmem>>, vector<1x32x64xf32>
    %183 = vector.shape_cast %182 : vector<1x32x64xf32> to vector<32x64xf32>
    %cst_49 = arith.constant dense<0.000000e+00> : vector<8x64xf32>
    %184 = tpu.matmul %181, %183, %cst_49 {dimension_numbers = #tpu.dot_dimension_numbers<[1], [0], [0], [1], [0, 0, 1, 1], [], []>} : vector<8x32xf32>, vector<32x64xf32>, vector<8x64xf32> -> vector<8x64xf32>
    %185 = vector.broadcast %12 : vector<1x64xf32> to vector<8x64xf32>
    %186 = arith.addf %184, %185 : vector<8x64xf32>
    %cst_50 = arith.constant 0.000000e+00 : f32
    %187 = vector.broadcast %cst_50 : f32 to vector<8x64xf32>
    %188 = arith.maximumf %186, %187 : vector<8x64xf32>
    %c0_51 = arith.constant 0 : index
    %c0_52 = arith.constant 0 : index
    %c0_53 = arith.constant 0 : index
    %189 = vector.load %arg10[%c0_51, %c0_52, %c0_53] : memref<1x64x32xf32, #tpu.memory_space<vmem>>, vector<1x64x32xf32>
    %190 = vector.shape_cast %189 : vector<1x64x32xf32> to vector<64x32xf32>
    %cst_54 = arith.constant dense<0.000000e+00> : vector<8x32xf32>
    %191 = tpu.matmul %188, %190, %cst_54 {dimension_numbers = #tpu.dot_dimension_numbers<[1], [0], [0], [1], [0, 0, 1, 1], [], []>} : vector<8x64xf32>, vector<64x32xf32>, vector<8x32xf32> -> vector<8x32xf32>
    %192 = vector.broadcast %13 : vector<1x32xf32> to vector<8x32xf32>
    %193 = arith.addf %191, %192 : vector<8x32xf32>
    %194 = arith.addf %181, %193 : vector<8x32xf32>
    %cst_55 = arith.constant dense<0.000000e+00> : vector<8xf32>
    %195 = vector.multi_reduction <add>, %194, %cst_55 [1] : vector<8x32xf32> to vector<8xf32>
    %196 = vector.shape_cast %195 : vector<8xf32> to vector<8x1xf32>
    %cst_56 = arith.constant 3.200000e+01 : f32
    %197 = vector.broadcast %cst_56 : f32 to vector<8x1xf32>
    %198 = arith.divf %196, %197 : vector<8x1xf32>
    %199 = vector.broadcast %198 : vector<8x1xf32> to vector<8x32xf32>
    %200 = arith.subf %194, %199 : vector<8x32xf32>
    %201 = arith.mulf %200, %200 : vector<8x32xf32>
    %cst_57 = arith.constant dense<0.000000e+00> : vector<8xf32>
    %202 = vector.multi_reduction <add>, %201, %cst_57 [1] : vector<8x32xf32> to vector<8xf32>
    %203 = vector.shape_cast %202 : vector<8xf32> to vector<8x1xf32>
    %cst_58 = arith.constant 3.200000e+01 : f32
    %204 = vector.broadcast %cst_58 : f32 to vector<8x1xf32>
    %205 = arith.divf %203, %204 : vector<8x1xf32>
    %cst_59 = arith.constant 9.99999974E-6 : f32
    %206 = vector.broadcast %cst_59 : f32 to vector<8x1xf32>
    %207 = arith.addf %205, %206 : vector<8x1xf32>
    %208 = math.rsqrt %207 : vector<8x1xf32>
    %209 = vector.broadcast %208 : vector<8x1xf32> to vector<8x32xf32>
    %210 = arith.mulf %200, %209 : vector<8x32xf32>
    %211 = vector.broadcast %18 : vector<1x32xf32> to vector<8x32xf32>
    %212 = arith.mulf %210, %211 : vector<8x32xf32>
    %213 = vector.broadcast %19 : vector<1x32xf32> to vector<8x32xf32>
    %214 = arith.addf %212, %213 : vector<8x32xf32>
    %c0_60 = arith.constant 0 : index
    %c0_61 = arith.constant 0 : index
    %215 = vector.load %arg15[%c0_60, %c0_61] : memref<8x32xf32, #tpu.memory_space<vmem>>, vector<8x32xf32>
    tpu.vector_store %arg15[%c0_60, %c0_61], %214 {strides = array<i32>} : memref<8x32xf32, #tpu.memory_space<vmem>>, vector<8x32xf32>,
    %c1_i32 = arith.constant 1 : i32
    %216 = arith.cmpi eq, %arg1, %c1_i32 : i32
    %217 = arith.extui %216 : i1 to i32
    %c0_i32_62 = arith.constant 0 : i32
    %218 = arith.cmpi ne, %217, %c0_i32_62 : i32
    scf.if %218 {
      %c0_63 = arith.constant 0 : index
      %c0_64 = arith.constant 0 : index
      %219 = vector.load %arg12[%c0_63, %c0_64] : memref<1x32xf32, #tpu.memory_space<vmem>>, vector<1x32xf32>
      %c0_65 = arith.constant 0 : index
      %c0_66 = arith.constant 0 : index
      %220 = vector.load %arg13[%c0_65, %c0_66] : memref<1x32xf32, #tpu.memory_space<vmem>>, vector<1x32xf32>
      %cst_67 = arith.constant dense<0.000000e+00> : vector<8xf32>
      %221 = vector.multi_reduction <add>, %214, %cst_67 [1] : vector<8x32xf32> to vector<8xf32>
      %222 = vector.shape_cast %221 : vector<8xf32> to vector<8x1xf32>
      %cst_68 = arith.constant 3.200000e+01 : f32
      %223 = vector.broadcast %cst_68 : f32 to vector<8x1xf32>
      %224 = arith.divf %222, %223 : vector<8x1xf32>
      %225 = vector.broadcast %224 : vector<8x1xf32> to vector<8x32xf32>
      %226 = arith.subf %214, %225 : vector<8x32xf32>
      %227 = arith.mulf %226, %226 : vector<8x32xf32>
      %cst_69 = arith.constant dense<0.000000e+00> : vector<8xf32>
      %228 = vector.multi_reduction <add>, %227, %cst_69 [1] : vector<8x32xf32> to vector<8xf32>
      %229 = vector.shape_cast %228 : vector<8xf32> to vector<8x1xf32>
      %cst_70 = arith.constant 3.200000e+01 : f32
      %230 = vector.broadcast %cst_70 : f32 to vector<8x1xf32>
      %231 = arith.divf %229, %230 : vector<8x1xf32>
      %cst_71 = arith.constant 9.99999974E-6 : f32
      %232 = vector.broadcast %cst_71 : f32 to vector<8x1xf32>
      %233 = arith.addf %231, %232 : vector<8x1xf32>
      %234 = math.rsqrt %233 : vector<8x1xf32>
      %235 = vector.broadcast %234 : vector<8x1xf32> to vector<8x32xf32>
      %236 = arith.mulf %226, %235 : vector<8x32xf32>
      %237 = vector.broadcast %219 : vector<1x32xf32> to vector<8x32xf32>
      %238 = arith.mulf %236, %237 : vector<8x32xf32>
      %239 = vector.broadcast %220 : vector<1x32xf32> to vector<8x32xf32>
      %240 = arith.addf %238, %239 : vector<8x32xf32>
      %c0_72 = arith.constant 0 : index
      %c0_73 = arith.constant 0 : index
      %241 = vector.load %arg14[%c0_72, %c0_73] : memref<8x32xf32, #tpu.memory_space<vmem>>, vector<8x32xf32>
      tpu.vector_store %arg14[%c0_72, %c0_73], %240 {strides = array<i32>} : memref<8x32xf32, #tpu.memory_space<vmem>>, vector<8x32xf32>,
    } else {
    }
    return
  }
  func.func @transform_0(%arg0: i32, %arg1: i32) -> (i32, i32) {
    %c0_i32 = arith.constant 0 : i32
    %c0_i32_0 = arith.constant 0 : i32
    return %arg0, %c0_i32 : i32, i32
  }
  func.func @transform_1(%arg0: i32, %arg1: i32) -> (i32, i32) {
    %c0_i32 = arith.constant 0 : i32
    %c0_i32_0 = arith.constant 0 : i32
    return %arg0, %c0_i32 : i32, i32
  }
  func.func @transform_2(%arg0: i32, %arg1: i32) -> (i32, i32) {
    %c0_i32 = arith.constant 0 : i32
    %c0_i32_0 = arith.constant 0 : i32
    return %arg0, %c0_i32 : i32, i32
  }
  func.func @transform_3(%arg0: i32, %arg1: i32) -> (i32, i32, i32) {
    %c0_i32 = arith.constant 0 : i32
    %c0_i32_0 = arith.constant 0 : i32
    %c0_i32_1 = arith.constant 0 : i32
    return %arg1, %c0_i32, %c0_i32_0 : i32, i32, i32
  }
  func.func @transform_4(%arg0: i32, %arg1: i32) -> (i32, i32, i32) {
    %c0_i32 = arith.constant 0 : i32
    %c0_i32_0 = arith.constant 0 : i32
    %c0_i32_1 = arith.constant 0 : i32
    return %arg1, %c0_i32, %c0_i32_0 : i32, i32, i32
  }
  func.func @transform_5(%arg0: i32, %arg1: i32) -> (i32, i32, i32) {
    %c0_i32 = arith.constant 0 : i32
    %c0_i32_0 = arith.constant 0 : i32
    %c0_i32_1 = arith.constant 0 : i32
    return %arg1, %c0_i32, %c0_i32_0 : i32, i32, i32
  }
  func.func @transform_6(%arg0: i32, %arg1: i32) -> (i32, i32, i32) {
    %c0_i32 = arith.constant 0 : i32
    %c0_i32_0 = arith.constant 0 : i32
    %c0_i32_1 = arith.constant 0 : i32
    return %arg1, %c0_i32, %c0_i32_0 : i32, i32, i32
  }
  func.func @transform_7(%arg0: i32, %arg1: i32) -> (i32, i32, i32) {
    %c0_i32 = arith.constant 0 : i32
    %c0_i32_0 = arith.constant 0 : i32
    %c0_i32_1 = arith.constant 0 : i32
    return %arg1, %c0_i32, %c0_i32_0 : i32, i32, i32
  }
  func.func @transform_8(%arg0: i32, %arg1: i32) -> (i32, i32, i32) {
    %c0_i32 = arith.constant 0 : i32
    %c0_i32_0 = arith.constant 0 : i32
    %c0_i32_1 = arith.constant 0 : i32
    return %arg1, %c0_i32, %c0_i32_0 : i32, i32, i32
  }
  func.func @transform_9(%arg0: i32, %arg1: i32) -> (i32, i32, i32) {
    %c0_i32 = arith.constant 0 : i32
    %c0_i32_0 = arith.constant 0 : i32
    %c0_i32_1 = arith.constant 0 : i32
    return %arg1, %c0_i32, %c0_i32_0 : i32, i32, i32
  }
  func.func @transform_10(%arg0: i32, %arg1: i32) -> (i32, i32) {
    %c0_i32 = arith.constant 0 : i32
    %c0_i32_0 = arith.constant 0 : i32
    %c0_i32_1 = arith.constant 0 : i32
    return %c0_i32, %c0_i32_0 : i32, i32
  }
  func.func @transform_11(%arg0: i32, %arg1: i32) -> (i32, i32) {
    %c0_i32 = arith.constant 0 : i32
    %c0_i32_0 = arith.constant 0 : i32
    %c0_i32_1 = arith.constant 0 : i32
    return %c0_i32, %c0_i32_0 : i32, i32
  }
  func.func @transform_12(%arg0: i32, %arg1: i32) -> (i32, i32) {
    %c0_i32 = arith.constant 0 : i32
    %c0_i32_0 = arith.constant 0 : i32
    return %arg0, %c0_i32 : i32, i32
  }
}

</mosaic_0001>

<bundles_post_ra>
// kernel: tpu_custom_call.1
= control target key start
LH: loop header
LB: loop body
LE: loop exit
PB: predicated region body
PF: predicated region fallthrough
CT: control target
= control target key end

     0   :  { %s4777_s0 = inlined_call_operand.hbm [shape: f32[16,32], index: 0, kind: input, shape index: {}]   ;;  %s4778_s1 = inlined_call_operand.hbm [shape: f32[32,32], index: 1, kind: input, shape index: {}]   ;;  %s4779_s2 = inlined_call_operand.hbm [shape: f32[16,32], index: 2, kind: input, shape index: {}]   ;;  %s4780_s3 = inlined_call_operand.vmem [shape: f32[2,32,96], index: 3, kind: input, shape index: {}]   ;;  %s4781_s4 = inlined_call_operand.vmem [shape: f32[2,32,32], index: 4, kind: input, shape index: {}]   ;;  %s4782_s5 = inlined_call_operand.vmem [shape: f32[2,32,96], index: 5, kind: input, shape index: {}]   ;;  %s4783_s6 = inlined_call_operand.hbm [shape: f32[2,32,32], index: 6, kind: input, shape index: {}]   ;;  %s4784_s7 = inlined_call_operand.hbm [shape: f32[2,32,64], index: 7, kind: input, shape index: {}]   ;;  %s4785_s8 = inlined_call_operand.vmem [shape: f32[2,64,32], index: 8, kind: input, shape index: {}]   ;;  %s4786_s9 = inlined_call_operand.hbm [shape: f32[2,16,128], index: 9, kind: input, shape index: {}]   ;;  %s4787_s10 = inlined_call_operand.vmem [shape: f32[1,32], index: 10, kind: input, shape index: {}]   ;;  %s4788_s11 = inlined_call_operand.vmem [shape: f32[1,32], index: 11, kind: input, shape index: {}]   ;;  %s4789_s12 = inlined_call_operand.hbm [shape: f32[16,32], index: 12, kind: output, shape index: {}]  }
   0x1   :  { %4816 = sst [smem:[#allocation35_spill]] %s4777_s0 }
   0x2   :  { %4817 = sst [smem:[#allocation36_spill]] %s4778_s1 }
   0x3   :  { %4818 = sst [smem:[#allocation37_spill]] %s4779_s2 }
   0x4   :  { %4819 = sst [smem:[#allocation38_spill]] %s4780_s3 }
   0x5   :  { %4820 = sst [smem:[#allocation39_spill]] %s4781_s4 }
   0x6   :  { %4821 = sst [smem:[#allocation40_spill]] %s4782_s5 }
   0x7   :  { %4822 = sst [smem:[#allocation41_spill]] %s4783_s6 }
   0x8   :  { %4823 = sst [smem:[#allocation42_spill]] %s4784_s7 }
   0x9   :  { %4824 = sst [smem:[#allocation43_spill]] %s4785_s8 }
   0xa   :  { %4825 = sst [smem:[#allocation44_spill]] %s4787_s10 }
   0xb   :  { %4826 = sst [smem:[#allocation45_spill]] %s4788_s11 }
   0xc   :  { %4827 = sst [smem:[#allocation46_spill]] %s4789_s12 }
   0xd   :  { %17 = vsyncpa [#allocation4], 0 }
   0xe   :  { %19 = vsyncpa [#allocation4 + $0x1], 0 }
   0xf   :  { %20 = vsyncpa [#allocation7], 0 }
  0x10   :  { %22 = vsyncpa [#allocation7 + $0x1], 0 }
  0x11   :  { %23 = vsyncpa [#allocation10], 0 }
  0x12   :  { %25 = vsyncpa [#allocation10 + $0x1], 0 }
  0x13   :  { %26 = vsyncpa [#allocation13], 0 }
  0x14   :  { %28 = vsyncpa [#allocation13 + $0x1], 0 }
  0x15   :  { %29 = vsyncpa [#allocation5], 0 }
  0x16   :  { %31 = vsyncpa [#allocation5 + $0x1], 0  ;;  %s4090_s21 = smov 0   ;;  %s4092_s22 = smov 0  }
  0x17   :  { %s4094_s23 = smov 0   ;;  %s4096_s24 = smov 0  }
  0x18   :  { %s4098_s25 = smov 0   ;;  %s4100_s26 = smov 0  }
  0x19   :  { %s4102_s27 = smov 0   ;;  %s4104_s28 = smov 0  }
  0x1a   :  { %s4106_s29 = smov 0   ;;  %s4108_s30 = smov 0  }
  0x1b   :  { %s4110_s13 = smov 0  }
  0x1c LB: > { %4828 = sst [smem:[#allocation20_spill]] %s3968_s22  ;;  %s4146_s14 = sadd.s32 4294967295, %s4004_s13   ;;  %s4004_s13 = sphi %s4110_s13, %s37_s13   ;;  %s4000_s30 = sphi %s4108_s30, %s4899_s30   ;;  %s3996_s29 = sphi %s4106_s29, %s4898_s29   ;;  %s3992_s28 = sphi %s4104_s28, %s4897_s28   ;;  %s3988_s27 = sphi %s4102_s27, %s4896_s27   ;;  %s3984_s26 = sphi %s4100_s26, %s4891_s26   ;;  %s3980_s25 = sphi %s4098_s25, %s4895_s25   ;;  %s3976_s24 = sphi %s4096_s24, %s4894_s24   ;;  %s3972_s23 = sphi %s4094_s23, %s4889_s23   ;;  %s3968_s22 = sphi %s4092_s22, %s4888_s22   ;;  %s3964_s21 = sphi %s4090_s21, %s4887_s21  }
  0x1d   : > { %4829 = sst [smem:[#allocation21_spill]] %s3972_s23  ;;  %s3160_s15 = sadd.s32 4294967294, %s4004_s13  }
  0x1e   : > { %4830 = sst [smem:[#allocation22_spill]] %s3976_s24  ;;  %p63_p0 = scmp.ne.s32.totalorder %s3984_s26, %s3980_s25 }
  0x1f   : > { %4831 = sst [smem:[#allocation23_spill]] %s3984_s26  ;;  %p64_p1 = scmp.eq.s32.totalorder %s4004_s13, 0 }
  0x20   : > { %4832 = sst [smem:[#allocation24_spill]] %s3988_s27  ;;  %p69_p2 = scmp.ne.s32.totalorder %s3980_s25, %s3976_s24 }
  0x21   : > { %4833 = sst [smem:[#allocation25_spill]] %s3992_s28  ;;  %p4796_p3 = scmp.eq.s32.totalorder %s4146_s14, 0 }
  0x22   : > { %4834 = sst [smem:[#allocation26_spill]] %s4146_s14  ;;  %p65_p4 = por %p64_p1, %p63_p0 }
  0x23   : > { %p369_p5 = scmp.eq.s32.totalorder %s4146_s14, 3  ;;  %p4162_p6 = por %p4796_p3, %p69_p2 }
  0x24   : > { %p375_p7 = scmp.eq.s32.totalorder %s3160_s15, 3  ;;  %p4795_p10 = scmp.lt.s32.totalorder %s4004_s13, 4 }
  0x25   : > { %s4835_s18 = scalar_select %p4162_p6, 1, 0 }
  0x26   : > { %p4166_p8 = por %p369_p5, %p63_p0  ;;  %p4170_p9 = por %p375_p7, %p69_p2 }
  0x27   : > { %4836 = sst [smem:[#allocation27_spill]] %s4835_s18  ;;  %s4176_s17 = sand.u32 1, %s3984_s26  }
  0x28   : > { %s4837_s19 = scalar_select %p4166_p8, 1, 0 }
  0x29   : > { %s4839_s20 = scalar_select %p4170_p9, 1, 0 }
  0x2a   : > { %4838 = sst [smem:[#allocation28_spill]] %s4837_s19  ;;  %s4802_s16 = sand.u32 1, %s4004_s13  }
  0x2b   : > { %4840 = sst [smem:[#allocation29_spill]] %s4839_s20  ;;  %p4181_p11 = pnand %p4795_p10, %p65_p4 }
  0x2c   : > { %s3165_s15 = sshll.u32 %s4176_s17, 4  ;;  %s3240_s12 = sshll.u32 %s4000_s30, 8 }
  0x2d   : > { %s4842_s1 = sld [smem:[#allocation36_spill]]  ;;  %s423_s10 = scalar_lea.vmem [#allocation6], %s3165_s15 }
  0x2e   : > { %s430_s20 = sshll.u32 %s423_s10, 4  ;;  %p3179_p12 = scmp.ge.s32.totalorder %s4004_s13, 1  ;;  %s431_s20 = int_to_ptr.vmem [resolvable:$true] %s430_s20 }
  0x2f   : > { %s4193_s8 = scalar_lea.sflag [#allocation7], %s4802_s16  ;;  %p4797_p13 = pneg %p4181_p11 }
  0x30   : > { %s3717_s5 = scalar_lea.vmem %s431_s20, 256  ;;  %s4006_s4 = smov [#allocation6]  }
  0x31   : > { %p3718_p0 = scmp.ne.s32.totalorder %s431_s20, %s3717_s5  ;;  %s3722_s3 = sshll.u32 %s4006_s4, 4  ;;  %s3723_s3 = int_to_ptr.vmem [resolvable:$false] %s3722_s3 }
  0x32   : > { %s3724_s28 = scalar_lea.vmem %s3723_s3, 512  ;;  %p3725_p5 = scmp.lt.s32.totalorder %s431_s20, %s3723_s3 }
  0x33   : > { %s429_s11 = scalar_lea.hbm %s4842_s1, %s3240_s12  ;;  %p3720_p2 = pnand %p3718_p0, %p4797_p13 }
  0x34   : > { %p3726_p7 = scmp.lt.s32.totalorder %s3724_s28, %s3717_s5 }
  0x35   : > { %p3721_p4 = pneg %p3720_p2 }
  0x36   : > { %p3727_p10 = por %p3726_p7, %p3725_p5 }
  0x38   : > { %p3728_p3 = pnand %p3727_p10, %p3721_p4 }
  0x3a   : > { %3731 = shalt.err (!%p3728_p3)
}
  0x3b   : > { %s4798_s10 = smov 128   ;;  %s4800_s3 = smov 8  }
  0x3c   : > { %3545 = dma.hbm_to_vmem [thread:$0]  (!%p4181_p11), %s429_s11, 256, %s431_s20, %s4193_s8, %s4798_s10, %s4798_s10, %s4800_s3  }
  0x3d   : > { %p551_p3 = scmp.lt.s32.totalorder %s4004_s13, 5  ;;  %s46_s5 = sadd.s32 1, %s3996_s29 }
  0x3e   : > { %s212_s12 = sadd.s32 1, %s3972_s23  ;;  %p47_p0 = scmp.ge.s32.totalorder %s46_s5, 2 }
  0x3f   : > { %p4209_p10 = pnand %p3179_p12, %p551_p3  ;;  %p219_p2 = scmp.ne.s32.totalorder %s3972_s23, %s3968_s22 }
  0x40   : > { %p225_p4 = scmp.ne.s32.totalorder %s3968_s22, %s3964_s21  ;;  %s4901_s5 = smov (%p47_p0, %s46_s5), 0 }
  0x41   : > { %4844 = sst [smem:[#allocation30_spill]] %s4901_s5  ;;  %s4845_s19 = sadd.s32 1, %s4000_s30 }
  0x42   : > { %s4903_s19 = smov (!%p47_p0, %s4845_s19), %s4000_s30  ;;  %s209_s11 = ssub.s32 %s3996_s29, %s4901_s5 }
  0x43   : > { %p4228_p12 = por %p219_p2, %p64_p1  ;;  %p51_p5 = scmp.ge.s32.totalorder %s4903_s19, 2 }
  0x44   : > { %p210_p7 = scmp.eq.s32.totalorder %s209_s11, 0  ;;  %p4847_p3 = scmp.eq.s32.totalorder %s4146_s14, 0 }
  0x45   : > { %s4239_s15 = sand.u32 1, %s3972_s23   ;;  %s4905_s19 = smov (%p51_p5, %s4903_s19), 0 }
  0x46   : > { %p4234_p13 = por %p225_p4, %p4847_p3  ;;  %4850 = sst [smem:[#allocation32_spill]] %s4905_s19 }
  0x47   : > { %s4244_s28 = scalar_select %p210_p7, %s3972_s23, %s212_s12  }
  0x48   : > { %s4848_s21 = scalar_select %p4234_p13, 1, 0 }
  0x49   : > { %4851 = sst [smem:[#allocation33_spill]] %s4244_s28  ;;  %s53_s10 = ssub.s32 %s4000_s30, %s4905_s19 }
  0x4a   : > { %4849 = sst [smem:[#allocation31_spill]] %s4848_s21  ;;  %s3170_s3 = sshll.u32 %s4239_s15, 5 }
  0x4b   : > { %p54_p1 = scmp.eq.s32.totalorder %s53_s10, 0  ;;  %s3241_s16 = sshll.u32 %s3996_s29, 9 }
  0x4c   : > { %s486_s1 = scalar_lea.vmem [#allocation9], %s3170_s3  ;;  %s4852_s5 = sadd.s32 1, %s3984_s26 }
  0x4d   : > { %s493_s11 = sshll.u32 %s486_s1, 4  ;;  %s4854_s6 = sld [smem:[#allocation41_spill]]  ;;  %s494_s11 = int_to_ptr.vmem [resolvable:$true] %s493_s11 }
  0x4e   : > { %s4253_s27 = scalar_select %p54_p1, %s3984_s26, %s4852_s5  }
  0x4f   : > { %p4855_p0 = scmp.lt.s32.totalorder %s4004_s13, 4  ;;  %s4857_s7 = sld [smem:[#allocation42_spill]] }
  0x50   : > { %4853 = sst [smem:[#allocation34_spill]] %s4253_s27  ;;  %s507_s10 = scalar_lea.vmem [#allocation11], %s3170_s3 }
  0x51   : > { %p4262_p2 = pnand %p4855_p0, %p4228_p12  ;;  %s514_s5 = sshll.u32 %s507_s10, 4  ;;  %s4271_s5 = int_to_ptr.vmem [resolvable:$true] %s514_s5 }
  0x52   : > { %s4858_s22 = sand.u32 1, %s4004_s13   ;;  %s3745_s20 = scalar_lea.vmem %s494_s11, 512 }
  0x53   : > { %s492_s14 = scalar_lea.hbm %s4854_s6, %s3241_s16  ;;  %s4275_s21 = scalar_lea.sflag [#allocation10], %s4858_s22 }
  0x54   : > { %p4814_p4 = pneg %p4262_p2  ;;  %p3746_p12 = scmp.ne.s32.totalorder %s494_s11, %s3745_s20 }
  0x55   : > { %s4269_s1 = scalar_lea.hbm %s4857_s7, %s3241_s16  ;;  %s4009_s19 = smov [#allocation9]  }
  0x56   : > { %p3748_p5 = pnand %p3746_p12, %p4814_p4  ;;  %s3750_s12 = sshll.u32 %s4009_s19, 4  ;;  %s3751_s12 = int_to_ptr.vmem [resolvable:$false] %s3750_s12 }
  0x57   : > { %s3752_s16 = scalar_lea.vmem %s3751_s12, 1024  ;;  %p3753_p3 = scmp.lt.s32.totalorder %s494_s11, %s3751_s12 }
  0x58   : > { %p3749_p7 = pneg %p3748_p5  ;;  %p3754_p1 = scmp.lt.s32.totalorder %s3752_s16, %s3745_s20 }
  0x5a   : > { %p3755_p0 = por %p3754_p1, %p3753_p3 }
  0x5c   : > { %p3756_p9 = pnand %p3755_p0, %p3749_p7 }
  0x5e   : > { %3759 = shalt.err (!%p3756_p9)
}
  0x5f   : > { %s4859_s3 = smov 8   ;;  %s4860_s10 = smov 128  }
  0x60   : > { %3551 = dma.hbm_to_vmem [thread:$0]  (!%p4262_p2), %s492_s14, 512, %s494_s11, %s4275_s21, %s4860_s10, %s4860_s10, %s4859_s3  }
  0x61   : > { %s3163_s22 = sshll.u32 %s4176_s17, 3  ;;  %s3164_s19 = sshll.u32 %s4000_s30, 7 }
  0x62   : > { %s4861_s0 = sld [smem:[#allocation35_spill]]  ;;  %s405_s12 = scalar_lea.vmem [#allocation3], %s3163_s22 }
  0x63   : > { %s412_s16 = sshll.u32 %s405_s12, 4  ;;  %s402_s27 = scalar_lea.sflag [#allocation4], %s4176_s17  ;;  %s413_s16 = int_to_ptr.vmem [resolvable:$true] %s412_s16 }
  0x64   : > { %s3773_s26 = scalar_lea.vmem %s413_s16, 128  ;;  %p4862_p12 = pneg %p4181_p11 }
  0x65   : > { %p3774_p9 = scmp.ne.s32.totalorder %s413_s16, %s3773_s26  ;;  %s4010_s28 = smov [#allocation3]  }
  0x66   : > { %s3778_s23 = sshll.u32 %s4010_s28, 4  ;;  %s3779_s23 = int_to_ptr.vmem [resolvable:$false] %s3778_s23 }
  0x67   : > { %p3776_p5 = pnand %p3774_p9, %p4862_p12  ;;  %s3780_s14 = scalar_lea.vmem %s3779_s23, 256 }
  0x68   : > { %s410_s20 = scalar_lea.hbm %s4861_s0, %s3164_s19  ;;  %p3781_p3 = scmp.lt.s32.totalorder %s413_s16, %s3779_s23 }
  0x69   : > { %p3777_p7 = pneg %p3776_p5  ;;  %p3782_p1 = scmp.lt.s32.totalorder %s3780_s14, %s3773_s26 }
  0x6b   : > { %p3783_p0 = por %p3782_p1, %p3781_p3 }
  0x6d   : > { %p3784_p4 = pnand %p3783_p0, %p3777_p7 }
  0x6f   : > { %3787 = shalt.err (!%p3784_p4)
}
  0x70   : > { %3542 = dma.hbm_to_vmem [thread:$0]  (!%p4181_p11), %s410_s20, 128, %s413_s16, %s402_s27  }
  0x71   : > { %s4863_s2 = sld [smem:[#allocation37_spill]]  ;;  %s444_s11 = scalar_lea.vmem [#allocation8], %s3163_s22 }
  0x72   : > { %s451_s12 = sshll.u32 %s444_s11, 4  ;;  %s4011_s23 = smov [#allocation8]   ;;  %s452_s12 = int_to_ptr.vmem [resolvable:$true] %s451_s12 }
  0x73   : > { %s3801_s0 = scalar_lea.vmem %s452_s12, 128  ;;  %s3806_s26 = sshll.u32 %s4011_s23, 4  ;;  %s3807_s26 = int_to_ptr.vmem [resolvable:$false] %s3806_s26 }
  0x74   : > { %p3802_p9 = scmp.ne.s32.totalorder %s452_s12, %s3801_s0  ;;  %s3808_s28 = scalar_lea.vmem %s3807_s26, 256 }
  0x75   : > { %p3809_p4 = scmp.lt.s32.totalorder %s452_s12, %s3807_s26  ;;  %p3810_p7 = scmp.lt.s32.totalorder %s3808_s28, %s3801_s0 }
  0x76   : > { %p3804_p5 = pnand %p3802_p9, %p4862_p12 }
  0x77   : > { %s449_s17 = scalar_lea.hbm %s4863_s2, %s3164_s19  ;;  %p3811_p3 = por %p3810_p7, %p3809_p4 }
  0x78   : > { %p3805_p8 = pneg %p3804_p5 }
  0x7a   : > { %p3812_p1 = pnand %p3811_p3, %p3805_p8 }
  0x7c   : > { %3815 = shalt.err (!%p3812_p1)
}
  0x7d   : > { %3548 = dma.hbm_to_vmem [thread:$0]  (!%p4181_p11), %s449_s17, 128, %s452_s12, %s4193_s8  }
  0x7e   : > { %s3829_s27 = scalar_lea.vmem %s4271_s5, 512  ;;  %p4864_p9 = pneg %p4262_p2 }
  0x7f   : > { %p3830_p0 = scmp.ne.s32.totalorder %s4271_s5, %s3829_s27  ;;  %s4012_s22 = smov [#allocation11]  }
  0x80   : > { %s3834_s19 = sshll.u32 %s4012_s22, 4  ;;  %s3835_s19 = int_to_ptr.vmem [resolvable:$false] %s3834_s19 }
  0x81   : > { %p3832_p12 = pnand %p3830_p0, %p4864_p9  ;;  %s3836_s0 = scalar_lea.vmem %s3835_s19, 1024 }
  0x82   : > { %p3837_p8 = scmp.lt.s32.totalorder %s4271_s5, %s3835_s19  ;;  %p3838_p4 = scmp.lt.s32.totalorder %s3836_s0, %s3829_s27 }
  0x83   : > { %p3833_p5 = pneg %p3832_p12 }
  0x84   : > { %p3839_p7 = por %p3838_p4, %p3837_p8 }
  0x86   : > { %p3840_p3 = pnand %p3839_p7, %p3833_p5 }
  0x88   : > { %3843 = shalt.err (!%p3840_p3)
}
  0x89   : > { %3554 = dma.hbm_to_vmem [thread:$0]  (!%p4262_p2), %s4269_s1, 512, %s4271_s5, %s4275_s21, %s4860_s10, %s4860_s10, %s4859_s3  }
  0x8a   : > { %s3176_s8 = sshll.u32 %s4239_s15, 4  ;;  %s3243_s24 = sshll.u32 %s3996_s29, 8 }
  0x8b   : > { %s542_s14 = scalar_lea.hbm %s4786_s9, %s3243_s24  ;;  %s536_s6 = scalar_lea.vmem [#allocation12], %s3176_s8 }
  0x8c   : > { %s543_s7 = sshll.u32 %s536_s6, 4  ;;  %s533_s17 = scalar_lea.sflag [#allocation13], %s4239_s15  ;;  %s544_s7 = int_to_ptr.vmem [resolvable:$true] %s543_s7 }
  0x8d   : > { %s3857_s11 = scalar_lea.vmem %s544_s7, 256  ;;  %p4865_p1 = pmov %p4864_p9 }
  0x8e   : > { %p3858_p11 = scmp.ne.s32.totalorder %s544_s7, %s3857_s11  ;;  %s4013_s12 = smov [#allocation12]  }
  0x8f   : > { %s3862_s23 = sshll.u32 %s4013_s12, 4  ;;  %s3863_s23 = int_to_ptr.vmem [resolvable:$false] %s3862_s23 }
  0x90   : > { %p3860_p0 = pnand %p3858_p11, %p4865_p1  ;;  %s3864_s1 = scalar_lea.vmem %s3863_s23, 512 }
  0x91   : > { %p3865_p12 = scmp.lt.s32.totalorder %s544_s7, %s3863_s23  ;;  %p3866_p5 = scmp.lt.s32.totalorder %s3864_s1, %s3857_s11 }
  0x92   : > { %p3861_p9 = pneg %p3860_p0 }
  0x93   : > { %p3867_p8 = por %p3866_p5, %p3865_p12 }
  0x95   : > { %p3868_p4 = pnand %p3867_p8, %p3861_p9 }
  0x97   : > { %3871 = shalt.err (!%p3868_p4)
}
  0x98   : > { %3557 = dma.hbm_to_vmem [thread:$0]  (!%p4262_p2), %s542_s14, 256, %s544_s7, %s533_s17, %s4860_s10, %s4860_s10, %s4859_s3  }
  0x99   : > { %555 = sbr.rel (%p4209_p10) target bundleno = 4644 (0x1224), region = 68  ;;  %s4339_s5 = sand.u32 (!%p4209_p10), 1, %s3980_s25  }
  0x9a   : > { %s4342_s21 = sshll.u32 (!%p4209_p10), %s4339_s5, 3  ;;  %s558_s26 = scalar_lea.sflag (!%p4209_p10), [#allocation4], %s4339_s5 }
  0x9e   : > { %3943 = dma.done.wait (%p4162_p6), %s558_s26, 128  }
  0x9f   : > { %3945 = vsyncadd (%p4162_p6), %s558_s26, 4294967168  ;;  %s4867_s18 = sld [smem:[#allocation26_spill]]  ;;  %s3181_s3 = sshll.u32 %s4339_s5, 4 }
  0xa0   : > { %s4352_s27 = scalar_lea.vmem [#allocation6], %s3181_s3 }
  0xa5   : > { %s566_s4 = sand.u32 1, %s4867_s18  }
  0xa6   : > { %s567_s10 = scalar_lea.sflag [#allocation7], %s566_s4 }
  0xa7   : > { %3947 = dma.done.wait (%p4162_p6), %s567_s10, 384  }
  0xa8   : > { %3949 = vsyncadd (%p4162_p6), %s567_s10, 4294966912  ;;  %s4868_s22 = sld [smem:[#allocation20_spill]]  ;;  %s585_s20 = scalar_lea.sflag [#allocation10], %s566_s4 }
  0xae   : > { %s586_s0 = sand.u32 1, %s4868_s22  }
  0xaf   : > { %s3183_s8 = sshll.u32 %s586_s0, 5 }
  0xb0   : > { %s4360_s16 = scalar_lea.vmem [#allocation9], %s3183_s8 }
  0xb1   : > { %3951 = dma.done.wait (%p4234_p13), %s585_s20, 1024  }
  0xb2   : > { %3953 = vsyncadd (%p4234_p13), %s585_s20, 4294966272  ;;  %s3185_s14 = sshll.u32 %s586_s0, 4  ;;  %s4366_s6 = scalar_lea.vmem [#allocation11], %s3183_s8 }
  0xb3   : > { %s603_s7 = scalar_lea.sflag [#allocation13], %s586_s0  ;;  %s4368_s17 = scalar_lea.vmem [#allocation12], %s3185_s14 }
  0xb4   : > { %3955 = dma.done.wait (%p4234_p13), %s603_s7, 256  }
  0xb5   : > { %3957 = vsyncadd (%p4234_p13), %s603_s7, 4294967040  ;;  %s4870_s11 = sld [smem:[#allocation24_spill]] }
  0xb6   : > { %s4871_s18 = sld [smem:[#allocation38_spill]] }
  0xb7   : > { %s4872_s22 = sld [smem:[#allocation39_spill]] }
  0xb8   : > { %s4873_s19 = sld [smem:[#allocation40_spill]] }
  0xb9   : > { %s4874_s28 = sld [smem:[#allocation43_spill]] }
  0xbb   : > { %p693_p6 = scmp.lt.s32.totalorder %s4870_s11, 1  ;;  %p3195_p13 = scmp.ne.s32.totalorder %s4870_s11, 0 }
  0xbc   : > { %s4875_s15 = scalar_lea.vmem (!%p3195_p13), [#allocation3], %s4342_s21 }
  0xbd   : > { %s694_s12 = scalar_select %p693_p6, %s4870_s11, 1 }
  0xbe   : > { %716 = sbr.rel (%p3195_p13) target bundleno = 197 (0xc5), region = 96 }
  0xbf   : > { %s3244_s23 = sshll.u32 %s694_s12, 5  ;;  %s3247_s1 = sshll.u32 %s694_s12, 6 }
  0xc0   : > { %s697_s4 = scalar_lea.vmem %s4871_s18, %s3244_s23  ;;  %s4382_s0 = scalar_lea.vmem %s4872_s22, %s3244_s23 }
  0xc1   : > { %s4387_s14 = scalar_lea.vmem %s4873_s19, %s3244_s23  ;;  %s4392_s2 = scalar_lea.vmem %s4874_s28, %s3247_s1 }
  0xc2   : > { %s691_s12 = scalar_lea.vmem [#allocation14], %s4342_s21 }
  0xc3   : > { %v717_v0 = vld [vmem:[%s4875_s15] sm:$0xff]  ;;  %vm718_vm0 = vcmask 261120  }
  0xc4   : > { %719 = vst.msk [vmem:[#allocation2] sm:$0xff] %vm718_vm0, %v717_v0 }
  0xc5 PF: > { %v730_v1 = vld [vmem:[%s697_s4 + $0x18] sm:$0xff]  ;;  %v4014_v2 = vmov 0.0   ;;  %v729_v3 = vld [vmem:[%s697_s4 + $0x10] sm:$0xff]  ;;  %vm4015_vm1 = vmmov 0   ;;  %s4876_s28 = scalar_lea.vmem [#allocation8], %s4342_s21  ;;  %v728_v6 = vld [vmem:[%s697_s4 + $0x8] sm:$0xff]  ;;  %v735_v9 = vlaneseq }
  0xc6   : > { %3333 = vmatprep.subr.mxu1 %v4014_v2  ;;  %3341 = vmatprep.mubr.msk.f32.mxu1 %vm4015_vm1, %v4014_v2  ;;  %v4405_v5 = vld [vmem:[%s4876_s28] sm:$0xff]  ;;  %vm739_vm2 = vcmask 261120   ;;  %v4423_v12 = vld [vmem:[%s4368_s17] sm:$0xff]  ;;  %s4016_s24 = smov 104   ;;  %s4017_s11 = smov 120   ;;  %vm933_vm3 = vcmask 64512  }
  0xc7   : > { %3334 = vmatpush3.msra.mxu1 %v730_v1  ;;  %3355 = vmatprep.subr.mxu0 %v4014_v2  ;;  %v727_v7 = vld [vmem:[%s697_s4] sm:$0xff]  ;;  %v4419_v10 = vshrl.u32 %v735_v9, 7  ;;  %s4018_s23 = smov 64   ;;  %s4019_s1 = smov 112   ;;  %vm1585_vm4 = vcmask 130048   ;;  %vm1587_vm5 = vcmask 195584  }
  0xc8   : > { %3335 = vmatprep.subr.mxu1 %v4014_v2  ;;  %3357 = vmatprep.mubr.msk.f32.mxu0 %vm4015_vm1, %v4014_v2  ;;  %s4020_s26 = smov 96   ;;  %s4021_s18 = smov 8   ;;  %vm2774_vm6 = vcmask 523264  }
  0xc9   : > { %3336 = vmatpush3.msra.mxu1 %v729_v3  ;;  %v737_v11 = vsub.s32 0, %v4419_v10  ;;  %s4022_s4 = smov 16   ;;  %s4023_s3 = smov 24  }
  0xca   : > { %3337 = vmatprep.subr.mxu1 %v4014_v2 }
  0xcb   : > { %v4401_v4 = vld [vmem:[#allocation2] sm:$0xff]  ;;  %3338 = vmatpush3.msra.mxu1 %v728_v6  ;;  %v4428_v13 = vrot.slane %v4423_v12, %v737_v11 }
  0xcc   : > { %v726_v8 = vadd.f32 %v4405_v5, %v4401_v4  ;;  %3339 = vmatprep.subr.mxu1 %v4014_v2 }
  0xcd   : > { %3340 = vmatpush3.msra.mxu1 %v727_v7 }
  0xce   : > { %3342 = vmatmul.mubr.msk.f32.vlgmr.msra.gmra.mxu1 %vm739_vm2, %v726_v8  ;;  %3344 = vmatprep.subr.mxu1 %v4014_v2 }
  0xcf   : > { %3352 = vmatprep.mubr.msk.f32.mxu1 %vm4015_vm1, %v4014_v2 }
 0x18e   : > { %v809_v14 = vpop.f32.mrf.mxu1 }
 0x18f   : > { %v810_v15 = vadd.f32 %v809_v14, %v4428_v13 }
 0x190   : > { %v3343_v16 = vpop.f32.mrf.mxu1 }
 0x191   : > { %919 = vrot.lane.b32.xlu1 %v810_v15, %s4016_s24  ;;  %915 = vrot.lane.b32.xlu0 %v810_v15, %s4017_s11  ;;  %v906_v17 = vmul.f32 0.35355338, %v810_v15 }
 0x195   : > { %823 = vrot.lane.b32.xlu1 %v730_v1, %s4018_s23  ;;  %917 = vrot.lane.b32.xlu0 %v810_v15, %s4019_s1 }
 0x199   : > { %819 = vrot.lane.b32.xlu1 %v728_v6, %s4018_s23  ;;  %821 = vrot.lane.b32.xlu0 %v729_v3, %s4018_s23 }
 0x19d   : > { %931 = vrot.lane.b32.xlu1 %v810_v15, %s4020_s26  ;;  %817 = vrot.lane.b32.xlu0 %v727_v7, %s4018_s23 }
 0x1a1   : > { %908 = vrot.lane.b32.xlu1 %v906_v17, %s4017_s11 }
 0x203   : > { %v920_v18 = vpop.permute.xlu1 %919  ;;  %v916_v19 = vpop.permute.xlu0 %915 }
 0x204   : > { %1008 = vrot.lane.b32.xlu0 %v916_v19, %s4020_s26  ;;  %1160 = vrot.lane.b32.xlu1 %v920_v18, %s4020_s26 }
 0x207   : > { %v824_v20 = vpop.permute.xlu1 %823  ;;  %v918_v21 = vpop.permute.xlu0 %917 }
 0x208   : > { %1084 = vrot.lane.b32.xlu0 %v918_v21, %s4020_s26  ;;  %912 = vrot.lane.b32.xlu1 %v906_v17, %s4016_s24 }
 0x209   : > { %3345 = vmatpush3.msra.mxu1 %v824_v20 }
 0x20a   : > { %3346 = vmatprep.subr.mxu1 %v4014_v2 }
 0x20b   : > { %v820_v22 = vpop.permute.xlu1 %819  ;;  %v822_v23 = vpop.permute.xlu0 %821 }
 0x20c   : > { %910 = vrot.lane.b32.xlu0 %v906_v17, %s4019_s1  ;;  %3347 = vmatpush3.msra.mxu1 %v822_v23 }
 0x20d   : > { %3348 = vmatprep.subr.mxu1 %v4014_v2 }
 0x20e   : > { %3349 = vmatpush3.msra.mxu1 %v820_v22 }
 0x20f   : > { %v932_v24 = vpop.permute.xlu1 %931  ;;  %3350 = vmatprep.subr.mxu1 %v4014_v2  ;;  %v818_v25 = vpop.permute.xlu0 %817 }
 0x210   : > { %3356 = vmatpush3.xpose.msk.msra.mxu0 %vm933_vm3, %v932_v24  ;;  %3351 = vmatpush3.msra.mxu1 %v818_v25 }
 0x211   : > { %3353 = vmatmul.mubr.msk.f32.vlgmr.msra.gmra.mxu1 %vm739_vm2, %v4401_v4  ;;  %3360 = vmatprep.subr.mxu1 %v4014_v2 }
 0x212   : > { %3362 = vmatprep.mubr.msk.f32.mxu1 %vm4015_vm1, %v4014_v2  ;;  %3365 = vmatprep.subr.mxu0 %v4014_v2 }
 0x213   : > { %3358 = vmatmul.mubr.msk.f32.vlgmr.msra.gmra.mxu0 %vm933_vm3, %v906_v17  ;;  %v909_v26 = vpop.permute.xlu1 %908 }
 0x214   : > { %3367 = vmatprep.mubr.msk.f32.mxu0 %vm4015_vm1, %v4014_v2 }
 0x276   : > { %v1009_v27 = vpop.permute.xlu0 %1008  ;;  %v1161_v28 = vpop.permute.xlu1 %1160 }
 0x277   : > { %3361 = vmatpush3.xpose.msk.msra.mxu1 %vm933_vm3, %v1009_v27  ;;  %v734_v27 = vld [vmem:[%s4382_s0 + $0x18] sm:$0xff] }
 0x278   : > { %3370 = vmatprep.subr.mxu1 %v4014_v2 }
 0x27a   : > { %v1085_v29 = vpop.permute.xlu0 %1084  ;;  %3363 = vmatmul.mubr.msk.f32.vlgmr.msra.gmra.mxu1 %vm933_vm3, %v909_v26  ;;  %v913_v30 = vpop.permute.xlu1 %912 }
 0x27b   : > { %3366 = vmatpush3.xpose.msk.msra.mxu0 %vm933_vm3, %v1085_v29  ;;  %3371 = vmatpush3.xpose.msk.msra.mxu1 %vm933_vm3, %v1161_v28  ;;  %v733_v28 = vld [vmem:[%s4382_s0 + $0x10] sm:$0xff]  ;;  %v732_v29 = vld [vmem:[%s4382_s0 + $0x8] sm:$0xff] }
 0x27c   : > { %3372 = vmatprep.mubr.msk.f32.mxu1 %vm4015_vm1, %v4014_v2  ;;  %3375 = vmatprep.subr.mxu0 %v4014_v2 }
 0x27d   : > { %3380 = vmatprep.subr.mxu1 %v4014_v2 }
 0x27e   : > { %v911_v31 = vpop.permute.xlu0 %910  ;;  %3373 = vmatmul.mubr.msk.f32.vlgmr.msra.gmra.mxu1 %vm933_vm3, %v913_v30  ;;  %v731_v30 = vld [vmem:[%s4382_s0] sm:$0xff] }
 0x27f   : > { %3368 = vmatmul.mubr.msk.f32.vlgmr.msra.gmra.mxu0 %vm933_vm3, %v911_v31  ;;  %3382 = vmatprep.mubr.msk.f32.mxu1 %vm4015_vm1, %v4014_v2 }
 0x280   : > { %3377 = vmatprep.mubr.msk.f32.mxu0 %vm4015_vm1, %v4014_v2 }
 0x2d1   : > { %v902_v32 = vpop.f32.mrf.mxu1 }
 0x2d3   : > { %v1004_v33 = vpop.f32.mrf.mxu0  ;;  %v3354_v34 = vpop.f32.mrf.mxu1 }
 0x2d4   : > { %v1236_v35 = vsel %vm933_vm3, %v1004_v33, -inf }
 0x2d5   : > { %1237 = vmax.xlane.f32.xlu0 %v1236_v35  ;;  %v3359_v36 = vpop.f32.mrf.mxu0 }
 0x33a   : > { %v1080_v37 = vpop.f32.mrf.mxu1 }
 0x33b   : > { %v1239_v38 = vsel %vm933_vm3, %v1080_v37, -inf }
 0x33c   : > { %1240 = vmax.xlane.f32.xlu1 %v1239_v38  ;;  %v3364_v39 = vpop.f32.mrf.mxu1 }
 0x33e   : > { %v1232_v40 = vpop.f32.mrf.mxu1 }
 0x33f   : > { %v1156_v41 = vpop.f32.mrf.mxu0  ;;  %v1245_v45 = vsel %vm933_vm3, %v1232_v40, -inf }
 0x340   : > { %v3374_v42 = vpop.f32.mrf.mxu1  ;;  %v1242_v43 = vsel %vm933_vm3, %v1156_v41, -inf }
 0x341   : > { %1243 = vmax.xlane.f32.xlu0 %v1242_v43  ;;  %v3369_v44 = vpop.f32.mrf.mxu0  ;;  %v1695_v43 = vld [vmem:[%s4387_s14 + $0x18] sm:$0xff] }
 0x342   : > { %v1591_v44 = vsub.s32 1, %v4419_v10 }
 0x345   : > { %1246 = vmax.xlane.f32.xlu0 %v1245_v45  ;;  %v1592_v45 = vrot.slane %v4423_v12, %v1591_v44 }
 0x34d   : > { %830 = vrot.lane.b32.xlu1 %v4428_v13, %s4018_s23 }
 0x35e   : > { %v1238_v46 = vpop.xlane.xlu0 %1237 }
 0x35f   : > { %v1248_v47 = vsub.f32 %v1004_v33, %v1238_v46 }
 0x361   : > { %v1252_v48 = vmul.f32 1.442695, %v1248_v47 }
 0x363   : > { %3664 = vpow2.f32 %v1252_v48 }
 0x370   : > { %v3665_v49 = vpop.eup %3664 }
 0x371   : > { %v1260_v50 = vsel %vm933_vm3, %v3665_v49, 0.0 }
 0x372   : > { %1261 = vadd.xlane.f32.xlu0 %v1260_v50 }
 0x3c5   : > { %v1241_v51 = vpop.xlane.xlu1 %1240 }
 0x3c6   : > { %v1249_v52 = vsub.f32 %v1080_v37, %v1241_v51  ;;  %v1694_v51 = vld [vmem:[%s4387_s14 + $0x10] sm:$0xff] }
 0x3c8   : > { %v1254_v53 = vmul.f32 1.442695, %v1249_v52  ;;  %v1693_v52 = vld [vmem:[%s4387_s14 + $0x8] sm:$0xff] }
 0x3c9   : > { %v831_v54 = vpop.permute.xlu1 %830 }
 0x3ca   : > { %3666 = vpow2.f32 %v1254_v53  ;;  %v903_v55 = vadd.f32 %v902_v32, %v831_v54  ;;  %v1244_v56 = vpop.xlane.xlu0 %1243  ;;  %v1692_v53 = vld [vmem:[%s4387_s14] sm:$0xff] }
 0x3cb   : > { %v1250_v57 = vsub.f32 %v1156_v41, %v1244_v56 }
 0x3cc   : > { %922 = vrot.lane.b32.xlu1 %v903_v55, %s4017_s11  ;;  %3376 = vmatpush3.msra.mxu0 %v903_v55 }
 0x3cd   : > { %v1256_v58 = vmul.f32 1.442695, %v1250_v57  ;;  %3385 = vmatprep.subr.mxu0 %v4014_v2 }
 0x3ce   : > { %v1247_v59 = vpop.xlane.xlu0 %1246 }
 0x3cf   : > { %3668 = vpow2.f32 %v1256_v58  ;;  %v1251_v60 = vsub.f32 %v1232_v40, %v1247_v59 }
 0x3d0   : > { %928 = vrot.lane.b32.xlu1 %v903_v55, %s4016_s24 }
 0x3d1   : > { %v1258_v61 = vmul.f32 1.442695, %v1251_v60 }
 0x3d3   : > { %3670 = vpow2.f32 %v1258_v61  ;;  %v721_v61 = vld [vmem:[%s4352_s27] sm:$0xff] }
 0x3d7   : > { %v3667_v62 = vpop.eup %3666 }
 0x3d8   : > { %v1263_v63 = vsel %vm933_vm3, %v3667_v62, 0.0 }
 0x3d9   : > { %1264 = vadd.xlane.f32.xlu0 %v1263_v63 }
 0x3dc   : > { %v3669_v0 = vpop.eup %3668 }
 0x3dd   : > { %v1266_v1 = vsel %vm933_vm3, %v3669_v0, 0.0 }
 0x3de   : > { %1267 = vadd.xlane.f32.xlu0 %v1266_v1 }
 0x3e0   : > { %v3671_v3 = vpop.eup %3670 }
 0x3e1   : > { %v1269_v6 = vsel %vm933_vm3, %v3671_v3, 0.0 }
 0x3e2   : > { %1270 = vadd.xlane.f32.xlu0 %v1269_v6 }
 0x3f8   : > { %925 = vrot.lane.b32.xlu0 %v903_v55, %s4019_s1 }
 0x3fb   : > { %v1262_v7 = vpop.xlane.xlu0 %1261 }
 0x3fc   : > { %3672 = vrcp.f32 %v1262_v7  ;;  %1787 = vrot.lane.b32.xlu0 %v1695_v43, %s4020_s26  ;;  %v722_v7 = vld [vmem:[%s4352_s27 + $0x8] sm:$0xff] }
 0x409   : > { %v3673_v8 = vpop.eup %3672 }
 0x40a   : > { %v1273_v9 = vmul.f32 %v3673_v8, %v3665_v49  ;;  %v1683_v8 = vsub.s32 6, %v4419_v10 }
 0x40c   : > { %3378 = vmatmul.mubr.msk.f32.vlgmr.msra.gmra.mxu0 %vm933_vm3, %v1273_v9  ;;  %v1688_v9 = vsub.s32 7, %v4419_v10 }
 0x40d   : > { %3387 = vmatprep.mubr.msk.f32.mxu0 %vm4015_vm1, %v4014_v2 }
 0x43e   : > { %v923_v13 = vpop.permute.xlu1 %922 }
 0x43f   : > { %3381 = vmatpush3.msra.mxu1 %v923_v13  ;;  %v1684_v13 = vrot.slane %v4423_v12, %v1683_v8 }
 0x440   : > { %3390 = vmatprep.subr.mxu1 %v4014_v2 }
 0x442   : > { %v929_v20 = vpop.permute.xlu1 %928 }
 0x462   : > { %v1265_v14 = vpop.xlane.xlu0 %1264 }
 0x463   : > { %3674 = vrcp.f32 %v1265_v14 }
 0x467   : > { %v1268_v15 = vpop.xlane.xlu0 %1267 }
 0x468   : > { %3676 = vrcp.f32 %v1268_v15 }
 0x46b   : > { %v1271_v16 = vpop.xlane.xlu0 %1270 }
 0x46c   : > { %3678 = vrcp.f32 %v1271_v16  ;;  %v1689_v16 = vrot.slane %v4423_v12, %v1688_v9 }
 0x46f   : > { %v926_v17 = vpop.permute.xlu0 %925 }
 0x470   : > { %v3675_v18 = vpop.eup %3674  ;;  %3386 = vmatpush3.msra.mxu0 %v926_v17 }
 0x471   : > { %v1275_v19 = vmul.f32 %v3675_v18, %v3667_v62  ;;  %3395 = vmatprep.subr.mxu0 %v4014_v2  ;;  %v1702_v62 = vsub.s32 2, %v4419_v10 }
 0x473   : > { %3383 = vmatmul.mubr.msk.f32.vlgmr.msra.gmra.mxu1 %vm933_vm3, %v1275_v19  ;;  %v1703_v63 = vrot.slane %v4423_v12, %v1702_v62 }
 0x474   : > { %3391 = vmatpush3.msra.mxu1 %v929_v20  ;;  %3392 = vmatprep.mubr.msk.f32.mxu1 %vm4015_vm1, %v4014_v2 }
 0x475   : > { %v3677_v21 = vpop.eup %3676  ;;  %3406 = vmatprep.subr.mxu1 %v4014_v2 }
 0x476   : > { %v1277_v22 = vmul.f32 %v3677_v21, %v3669_v0 }
 0x478   : > { %3388 = vmatmul.mubr.msk.f32.vlgmr.msra.gmra.mxu0 %vm933_vm3, %v1277_v22 }
 0x479   : > { %v3679_v23 = vpop.eup %3678  ;;  %3403 = vmatprep.mubr.msk.f32.mxu0 %vm4015_vm1, %v4014_v2  ;;  %3396 = vmatpush3.msra.mxu0 %v734_v27 }
 0x47a   : > { %v1279_v24 = vmul.f32 %v3679_v23, %v3671_v3  ;;  %3397 = vmatprep.subr.mxu0 %v4014_v2 }
 0x47b   : > { %3398 = vmatpush3.msra.mxu0 %v733_v28 }
 0x47c   : > { %3393 = vmatmul.mubr.msk.f32.vlgmr.msra.gmra.mxu1 %vm933_vm3, %v1279_v24  ;;  %3399 = vmatprep.subr.mxu0 %v4014_v2 }
 0x47d   : > { %3414 = vmatprep.mubr.msk.f32.mxu1 %vm4015_vm1, %v4014_v2  ;;  %3400 = vmatpush3.msra.mxu0 %v732_v29 }
 0x47e   : > { %3401 = vmatprep.subr.mxu0 %v4014_v2  ;;  %3407 = vmatpush3.msra.mxu1 %v1695_v43 }
 0x47f   : > { %3402 = vmatpush3.msra.mxu0 %v731_v30  ;;  %3408 = vmatprep.subr.mxu1 %v4014_v2 }
 0x480   : > { %3409 = vmatpush3.msra.mxu1 %v1694_v51 }
 0x481   : > { %3410 = vmatprep.subr.mxu1 %v4014_v2 }
 0x482   : > { %3411 = vmatpush3.msra.mxu1 %v1693_v52 }
 0x483   : > { %3412 = vmatprep.subr.mxu1 %v4014_v2 }
 0x484   : > { %3413 = vmatpush3.msra.mxu1 %v1692_v53 }
 0x485   : > { %3428 = vmatprep.subr.mxu1 %v4014_v2 }
 0x4cc   : > { %v1349_v25 = vpop.f32.mrf.mxu0 }
 0x4ce   : > { %v3379_v26 = vpop.f32.mrf.mxu0 }
 0x533   : > { %v1422_v31 = vpop.f32.mrf.mxu1 }
 0x534   : > { %1573 = vrot.lane.b32.xlu1 %v1422_v31, %s4021_s18 }
 0x535   : > { %v3384_v32 = vpop.f32.mrf.mxu1 }
 0x538   : > { %v1495_v33 = vpop.f32.mrf.mxu0 }
 0x539   : > { %1577 = vrot.lane.b32.xlu1 %v1495_v33, %s4022_s4 }
 0x53a   : > { %v3389_v34 = vpop.f32.mrf.mxu0 }
 0x53c   : > { %v1568_v35 = vpop.f32.mrf.mxu1 }
 0x53d   : > { %1581 = vrot.lane.b32.xlu1 %v1568_v35, %s4023_s3 }
 0x53e   : > { %v3394_v36 = vpop.f32.mrf.mxu1 }
 0x5a6   : > { %v1574_v37 = vpop.permute.xlu1 %1573 }
 0x5a7   : > { %v1584_v39 = vsel %vm933_vm3, %v1349_v25, %v1574_v37 }
 0x5ab   : > { %v1578_v38 = vpop.permute.xlu1 %1577 }
 0x5ac   : > { %v1586_v40 = vsel %vm1585_vm4, %v1584_v39, %v1578_v38 }
 0x5af   : > { %v1582_v41 = vpop.permute.xlu1 %1581 }
 0x5b0   : > { %v1588_v42 = vsel %vm1587_vm5, %v1586_v40, %v1582_v41 }
 0x5b1   : > { %3404 = vmatmul.mubr.msk.f32.vlgmr.msra.gmra.mxu0 %vm739_vm2, %v1588_v42 }
 0x5b2   : > { %3425 = vmatprep.mubr.msk.f32.mxu0 %vm739_vm2, %v721_v61 }
 0x671   : > { %v1662_v46 = vpop.f32.mrf.mxu0 }
 0x672   : > { %v1663_v47 = vadd.f32 %v1662_v46, %v1592_v45 }
 0x673   : > { %v3405_v48 = vpop.f32.mrf.mxu0 }
 0x674   : > { %v1666_v49 = vadd.f32 %v1663_v47, %v4401_v4  ;;  %v1788_v4 = vpop.permute.xlu0 %1787 }
 0x675   : > { %3417 = vmatprep.subr.mxu0 %v1788_v4 }
 0x676   : > { %v1667_v50 = vsel %vm739_vm2, %v1666_v49, 0.0  ;;  %3418 = vmatpush3.msra.mxu0 %v1788_v4 }
 0x677   : > { %1668 = vadd.xlane.f32.xlu1 %v1667_v50 }
 0x688   : > { %1785 = vrot.lane.b32.xlu1 %v1694_v51, %s4020_s26 }
 0x68c   : > { %1783 = vrot.lane.b32.xlu1 %v1693_v52, %s4020_s26 }
 0x690   : > { %1794 = vrot.lane.b32.xlu1 %v1703_v63, %s4020_s26 }
 0x700   : > { %v1669_v54 = vpop.xlane.xlu1 %1668 }
 0x701   : > { %v1671_v55 = vmul.f32 0.03125, %v1669_v54 }
 0x703   : > { %v1672_v56 = vsub.f32 %v1666_v49, %v1671_v55 }
 0x704   : > { %v1786_v59 = vpop.permute.xlu1 %1785 }
 0x705   : > { %v1673_v57 = vmul.f32 %v1672_v56, %v1672_v56  ;;  %3419 = vmatprep.subr.mxu0 %v1786_v59 }
 0x706   : > { %3420 = vmatpush3.msra.mxu0 %v1786_v59 }
 0x707   : > { %v1674_v58 = vsel %vm739_vm2, %v1673_v57, 0.0 }
 0x708   : > { %1675 = vadd.xlane.f32.xlu0 %v1674_v58  ;;  %v1784_v60 = vpop.permute.xlu1 %1783 }
 0x709   : > { %3421 = vmatprep.subr.mxu0 %v1784_v60 }
 0x70a   : > { %3422 = vmatpush3.msra.mxu0 %v1784_v60 }
 0x70c   : > { %v1795_v20 = vpop.permute.xlu1 %1794 }
 0x71e   : > { %1781 = vrot.lane.b32.xlu0 %v1692_v53, %s4020_s26 }
 0x791   : > { %v1676_v0 = vpop.xlane.xlu0 %1675 }
 0x792   : > { %v1677_v1 = vmul.f32 0.03125, %v1676_v0 }
 0x794   : > { %v1678_v3 = vadd.f32 1e-05, %v1677_v1 }
 0x795   : > { %v1782_v6 = vpop.permute.xlu0 %1781 }
 0x796   : > { %3680 = vrsqrt.f32 %v1678_v3  ;;  %3423 = vmatprep.subr.mxu0 %v1782_v6 }
 0x797   : > { %3424 = vmatpush3.msra.mxu0 %v1782_v6 }
 0x798   : > { %3426 = vmatmul.mubr.msk.f32.vlgmr.msra.gmra.mxu0 %vm739_vm2, %v722_v7  ;;  %3435 = vmatprep.subr.mxu0 %v4014_v2 }
 0x799   : > { %3439 = vmatprep.mubr.msk.f32.mxu0 %vm4015_vm1, %v4014_v2 }
 0x7a3   : > { %v3681_v14 = vpop.eup %3680 }
 0x7a4   : > { %v1680_v15 = vmul.f32 %v3681_v14, %v1672_v56 }
 0x7a6   : > { %v1685_v17 = vmul.f32 %v1684_v13, %v1680_v15 }
 0x7a8   : > { %v4551_v18 = vadd.f32 %v1689_v16, %v1685_v17 }
 0x7aa   : > { %v1691_v19 = vadd.f32 %v4551_v18, %v4405_v5 }
 0x7ac   : > { %3415 = vmatmul.mubr.msk.f32.vlgmr.msra.gmra.mxu1 %vm739_vm2, %v1691_v19 }
 0x7ad   : > { %3432 = vmatprep.mubr.msk.f32.mxu1 %vm4015_vm1, %v4014_v2 }
 0x858   : > { %v3427_v21 = vpop.f32.mrf.mxu0 }
 0x859   : > { %v4558_v22 = vadd.f32 %v3427_v21, %v1795_v20 }
 0x85a   : > { %v1869_v23 = vpop.f32.mrf.mxu0 }
 0x85b   : > { %1890 = vrot.lane.b32.xlu0 %v4558_v22, %s4017_s11  ;;  %3429 = vmatpush3.xpose.msk.msra.mxu1 %vm933_vm3, %v4558_v22  ;;  %v1870_v24 = vadd.f32 %v1869_v23, %v1795_v20 }
 0x85c   : > { %3430 = vmatprep.subr.mxu1 %v4014_v2 }
 0x85d   : > { %1888 = vrot.lane.b32.xlu1 %v1870_v24, %s4017_s11 }
 0x85f   : > { %1894 = vrot.lane.b32.xlu0 %v4558_v22, %s4019_s1  ;;  %3431 = vmatpush3.xpose.msk.msra.mxu1 %vm933_vm3, %v1870_v24 }
 0x860   : > { %3442 = vmatprep.subr.mxu1 %v4014_v2 }
 0x863   : > { %1898 = vrot.lane.b32.xlu0 %v4558_v22, %s4016_s24 }
 0x867   : > { %1896 = vrot.lane.b32.xlu0 %v1870_v24, %s4016_s24 }
 0x86c   : > { %v1773_v5 = vpop.f32.mrf.mxu1 }
 0x86d   : > { %v1774_v25 = vadd.f32 %v1773_v5, %v1703_v63 }
 0x86e   : > { %v3416_v26 = vpop.f32.mrf.mxu1 }
 0x86f   : > { %v1878_v27 = vmul.f32 0.35355338, %v1774_v25 }
 0x871   : > { %1884 = vrot.lane.b32.xlu0 %v1878_v27, %s4016_s24  ;;  %1880 = vrot.lane.b32.xlu1 %v1878_v27, %s4017_s11 }
 0x872   : > { %3433 = vmatmul.mubr.msk.f32.vlgmr.msra.gmra.mxu1 %vm933_vm3, %v1878_v27 }
 0x873   : > { %3446 = vmatprep.mubr.msk.f32.mxu1 %vm4015_vm1, %v4014_v2 }
 0x875   : > { %1892 = vrot.lane.b32.xlu1 %v1870_v24, %s4019_s1 }
 0x879   : > { %1882 = vrot.lane.b32.xlu1 %v1878_v27, %s4019_s1 }
 0x8cd   : > { %v1891_v28 = vpop.permute.xlu0 %1890 }
 0x8ce   : > { %3436 = vmatpush3.xpose.msk.msra.mxu0 %vm933_vm3, %v1891_v28 }
 0x8cf   : > { %3437 = vmatprep.subr.mxu0 %v4014_v2  ;;  %v1889_v29 = vpop.permute.xlu1 %1888 }
 0x8d1   : > { %v1895_v30 = vpop.permute.xlu0 %1894 }
 0x8d2   : > { %3438 = vmatpush3.xpose.msk.msra.mxu0 %vm933_vm3, %v1889_v29  ;;  %3443 = vmatpush3.xpose.msk.msra.mxu1 %vm933_vm3, %v1895_v30 }
 0x8d3   : > { %3449 = vmatprep.subr.mxu0 %v4014_v2  ;;  %3444 = vmatprep.subr.mxu1 %v4014_v2 }
 0x8d5   : > { %v1899_v31 = vpop.permute.xlu0 %1898 }
 0x8d9   : > { %v4591_v33 = vpop.permute.xlu0 %1896 }
 0x8e3   : > { %v1881_v32 = vpop.permute.xlu1 %1880  ;;  %v1885_v35 = vpop.permute.xlu0 %1884 }
 0x8e4   : > { %3440 = vmatmul.mubr.msk.f32.vlgmr.msra.gmra.mxu0 %vm933_vm3, %v1881_v32 }
 0x8e5   : > { %3450 = vmatpush3.xpose.msk.msra.mxu0 %vm933_vm3, %v1899_v31  ;;  %3453 = vmatprep.mubr.msk.f32.mxu0 %vm4015_vm1, %v4014_v2 }
 0x8e6   : > { %3451 = vmatprep.subr.mxu0 %v4014_v2 }
 0x8e7   : > { %v4593_v34 = vpop.permute.xlu1 %1892 }
 0x8e8   : > { %3445 = vmatpush3.xpose.msk.msra.mxu1 %vm933_vm3, %v4593_v34 }
 0x8e9   : > { %3452 = vmatpush3.xpose.msk.msra.mxu0 %vm933_vm3, %v4591_v33  ;;  %3456 = vmatprep.subr.mxu1 %v4014_v2 }
 0x8ea   : > { %3470 = vmatprep.subr.mxu0 %v4014_v2 }
 0x8eb   : > { %v1883_v36 = vpop.permute.xlu1 %1882 }
 0x8ec   : > { %3454 = vmatmul.mubr.msk.f32.vlgmr.msra.gmra.mxu0 %vm933_vm3, %v1885_v35  ;;  %3447 = vmatmul.mubr.msk.f32.vlgmr.msra.gmra.mxu1 %vm933_vm3, %v1883_v36  ;;  %v1698_v35 = vld [vmem:[%s4360_s16 + $0x10] sm:$0xff]  ;;  %v1697_v36 = vld [vmem:[%s4360_s16 + $0x8] sm:$0xff] }
 0x8ed   : > { %3460 = vmatprep.mubr.msk.f32.mxu1 %vm4015_vm1, %v4014_v2  ;;  %3474 = vmatprep.mubr.msk.f32.mxu0 %vm4015_vm1, %v4014_v2 }
 0x932   : > { %v1972_v37 = vpop.f32.mrf.mxu1 }
 0x933   : > { %v2204_v38 = vsel %vm1585_vm4, %v1972_v37, -inf }
 0x934   : > { %2205 = vmax.xlane.f32.xlu1 %v2204_v38  ;;  %v3434_v39 = vpop.f32.mrf.mxu1 }
 0x9a4   : > { %v2048_v40 = vpop.f32.mrf.mxu0 }
 0x9a5   : > { %v2207_v41 = vsel %vm1585_vm4, %v2048_v40, -inf }
 0x9a6   : > { %2208 = vmax.xlane.f32.xlu0 %v2207_v41  ;;  %v3441_v42 = vpop.f32.mrf.mxu0 }
 0x9ac   : > { %v2200_v43 = vpop.f32.mrf.mxu0  ;;  %v2124_v45 = vpop.f32.mrf.mxu1 }
 0x9ad   : > { %v2213_v46 = vsel %vm1585_vm4, %v2200_v43, -inf  ;;  %v2210_v47 = vsel %vm1585_vm4, %v2124_v45, -inf }
 0x9ae   : > { %v3455_v48 = vpop.f32.mrf.mxu0  ;;  %2214 = vmax.xlane.f32.xlu1 %v2213_v46  ;;  %2211 = vmax.xlane.f32.xlu0 %v2210_v47  ;;  %v3448_v49 = vpop.f32.mrf.mxu1 }
 0x9bd   : > { %v2206_v50 = vpop.xlane.xlu1 %2205 }
 0x9be   : > { %v2216_v51 = vsub.f32 %v1972_v37, %v2206_v50  ;;  %v1696_v37 = vld [vmem:[%s4360_s16] sm:$0xff] }
 0x9bf   : > { %2248 = vrot.lane.b32.xlu1 %v1870_v24, %s4020_s26 }
 0x9c0   : > { %v2220_v52 = vmul.f32 1.442695, %v2216_v51  ;;  %v2581_v51 = vsub.s32 3, %v4419_v10 }
 0x9c2   : > { %3682 = vpow2.f32 %v2220_v52  ;;  %v2582_v52 = vrot.slane %v4423_v12, %v2581_v51 }
 0x9c3   : > { %2329 = vrot.lane.b32.xlu1 %v1891_v28, %s4020_s26 }
 0x9c4   : > { %2250 = vrot.lane.b32.xlu0 %v4558_v22, %s4020_s26 }
 0x9c7   : > { %2408 = vrot.lane.b32.xlu1 %v1895_v30, %s4020_s26 }
 0x9c8   : > { %2327 = vrot.lane.b32.xlu0 %v1889_v29, %s4020_s26 }
 0x9cc   : > { %2487 = vrot.lane.b32.xlu0 %v1899_v31, %s4020_s26 }
 0x9cf   : > { %v3683_v53 = vpop.eup %3682 }
 0x9d0   : > { %v2228_v4 = vsel %vm1585_vm4, %v3683_v53, 0.0 }
 0x9eb   : > { %2229 = vadd.xlane.f32.xlu0 %v2228_v4 }
 0xa2f   : > { %v2209_v54 = vpop.xlane.xlu0 %2208 }
 0xa30   : > { %v2217_v55 = vsub.f32 %v2048_v40, %v2209_v54 }
 0xa32   : > { %v2222_v56 = vmul.f32 1.442695, %v2217_v55 }
 0xa34   : > { %3684 = vpow2.f32 %v2222_v56 }
 0xa37   : > { %v2215_v57 = vpop.xlane.xlu1 %2214  ;;  %v2212_v58 = vpop.xlane.xlu0 %2211 }
 0xa38   : > { %v2219_v59 = vsub.f32 %v2200_v43, %v2215_v57  ;;  %v2218_v60 = vsub.f32 %v2124_v45, %v2212_v58 }
 0xa3a   : > { %v2226_v61 = vmul.f32 1.442695, %v2219_v59  ;;  %v2224_v63 = vmul.f32 1.442695, %v2218_v60 }
 0xa3b   : > { %v2249_v0 = vpop.permute.xlu1 %2248  ;;  %v2251_v1 = vpop.permute.xlu0 %2250 }
 0xa3c   : > { %3686 = vpow2.f32 %v2226_v61  ;;  %3457 = vmatpush3.msra.mxu1 %v2251_v1  ;;  %v2680_v1 = vld [vmem:[%s4366_s6] sm:$0xff] }
 0xa3d   : > { %3688 = vpow2.f32 %v2224_v63  ;;  %3458 = vmatprep.subr.mxu1 %v4014_v2  ;;  %v2683_v63 = vld [vmem:[%s4366_s6 + $0x18] sm:$0xff] }
 0xa3e   : > { %3459 = vmatpush3.msra.mxu1 %v2249_v0  ;;  %v2681_v0 = vld [vmem:[%s4366_s6 + $0x8] sm:$0xff] }
 0xa3f   : > { %v2330_v3 = vpop.permute.xlu1 %2329  ;;  %3463 = vmatprep.subr.mxu1 %v4014_v2  ;;  %v2328_v16 = vpop.permute.xlu0 %2327 }
 0xa41   : > { %v3685_v6 = vpop.eup %3684 }
 0xa42   : > { %v2231_v7 = vsel %vm1585_vm4, %v3685_v6, 0.0 }
 0xa43   : > { %v2409_v8 = vpop.permute.xlu1 %2408  ;;  %2232 = vadd.xlane.f32.xlu1 %v2231_v7  ;;  %v2488_v17 = vpop.permute.xlu0 %2487  ;;  %v2767_v7 = vld [vmem:[%s4392_s2 + $0x28] sm:$0xff] }
 0xa44   : > { %3471 = vmatpush3.msra.mxu0 %v2409_v8  ;;  %v2766_v8 = vld [vmem:[%s4392_s2 + $0x20] sm:$0xff] }
 0xa45   : > { %3472 = vmatprep.subr.mxu0 %v4014_v2 }
 0xa49   : > { %v3687_v9 = vpop.eup %3686 }
 0xa4a   : > { %v3689_v13 = vpop.eup %3688  ;;  %v2237_v14 = vsel %vm1585_vm4, %v3687_v9, 0.0 }
 0xa4b   : > { %2238 = vadd.xlane.f32.xlu1 %v2237_v14  ;;  %v2234_v15 = vsel %vm1585_vm4, %v3689_v13, 0.0 }
 0xa4c   : > { %2235 = vadd.xlane.f32.xlu0 %v2234_v15 }
 0xa5c   : > { %2406 = vrot.lane.b32.xlu1 %v4593_v34, %s4020_s26  ;;  %v1699_v34 = vld [vmem:[%s4360_s16 + $0x18] sm:$0xff] }
 0xa62   : > { %2485 = vrot.lane.b32.xlu0 %v4591_v33, %s4020_s26 }
 0xa74   : > { %v2230_v19 = vpop.xlane.xlu0 %2229 }
 0xa75   : > { %3690 = vrcp.f32 %v2230_v19 }
 0xa82   : > { %v3691_v20 = vpop.eup %3690 }
 0xa83   : > { %v2241_v21 = vmul.f32 %v3691_v20, %v3683_v53 }
 0xa85   : > { %3461 = vmatmul.mubr.msk.f32.vlgmr.msra.gmra.mxu1 %vm1585_vm4, %v2241_v21 }
 0xa86   : > { %3464 = vmatpush3.msra.mxu1 %v2330_v3  ;;  %3467 = vmatprep.mubr.msk.f32.mxu1 %vm4015_vm1, %v4014_v2  ;;  %v2769_v3 = vld [vmem:[%s4392_s2 + $0x38] sm:$0xff] }
 0xa87   : > { %3465 = vmatprep.subr.mxu1 %v4014_v2 }
 0xa88   : > { %3466 = vmatpush3.msra.mxu1 %v2328_v16  ;;  %v725_v16 = vld [vmem:[%s4368_s17 + $0x8] sm:$0xff] }
 0xa89   : > { %3477 = vmatprep.subr.mxu1 %v4014_v2  ;;  %v2678_v20 = vrot.slane %v725_v16, %v1591_v44 }
 0xacc   : > { %v2233_v22 = vpop.xlane.xlu1 %2232 }
 0xacd   : > { %3692 = vrcp.f32 %v2233_v22 }
 0xad4   : > { %v2239_v23 = vpop.xlane.xlu1 %2238 }
 0xad5   : > { %3694 = vrcp.f32 %v2239_v23  ;;  %v2236_v24 = vpop.xlane.xlu0 %2235 }
 0xad6   : > { %3696 = vrcp.f32 %v2236_v24  ;;  %v2764_v24 = vld [vmem:[%s4392_s2 + $0x10] sm:$0xff] }
 0xad8   : > { %v2407_v5 = vpop.permute.xlu1 %2406 }
 0xad9   : > { %3473 = vmatpush3.msra.mxu0 %v2407_v5  ;;  %v2486_v27 = vpop.permute.xlu0 %2485  ;;  %v2763_v5 = vld [vmem:[%s4392_s2 + $0x8] sm:$0xff] }
 0xada   : > { %v3693_v25 = vpop.eup %3692  ;;  %3484 = vmatprep.subr.mxu0 %v4014_v2 }
 0xadb   : > { %v2243_v26 = vmul.f32 %v3693_v25, %v3685_v6  ;;  %v2768_v6 = vld [vmem:[%s4392_s2 + $0x30] sm:$0xff]  ;;  %v2762_v25 = vld [vmem:[%s4392_s2] sm:$0xff] }
 0xadd   : > { %3468 = vmatmul.mubr.msk.f32.vlgmr.msra.gmra.mxu1 %vm1585_vm4, %v2243_v26 }
 0xade   : > { %3478 = vmatpush3.msra.mxu1 %v2488_v17  ;;  %3481 = vmatprep.mubr.msk.f32.mxu1 %vm4015_vm1, %v4014_v2  ;;  %v2673_v17 = vrot.slane %v725_v16, %v737_v11  ;;  %v2686_v11 = vsub.s32 4, %v4419_v10 }
 0xadf   : > { %3479 = vmatprep.subr.mxu1 %v4014_v2 }
 0xae0   : > { %3480 = vmatpush3.msra.mxu1 %v2486_v27  ;;  %v2687_v26 = vrot.slane %v4423_v12, %v2686_v11 }
 0xae1   : > { %3495 = vmatprep.subr.mxu1 %v4014_v2 }
 0xae2   : > { %v3695_v28 = vpop.eup %3694 }
 0xae3   : > { %v3697_v29 = vpop.eup %3696  ;;  %v2247_v30 = vmul.f32 %v3695_v28, %v3687_v9  ;;  %v2765_v9 = vld [vmem:[%s4392_s2 + $0x18] sm:$0xff]  ;;  %s4877_s2 = sld [smem:[#allocation24_spill]] }
 0xae4   : > { %v2245_v31 = vmul.f32 %v3697_v29, %v3689_v13 }
 0xae5   : > { %3482 = vmatmul.mubr.msk.f32.vlgmr.msra.gmra.mxu1 %vm1585_vm4, %v2247_v30  ;;  %v2772_v30 = vsub.s32 5, %v4419_v10 }
 0xae6   : > { %3475 = vmatmul.mubr.msk.f32.vlgmr.msra.gmra.mxu0 %vm1585_vm4, %v2245_v31  ;;  %3503 = vmatprep.mubr.msk.f32.mxu1 %vm4015_vm1, %v4014_v2 }
 0xae7   : > { %3492 = vmatprep.mubr.msk.f32.mxu0 %vm4015_vm1, %v4014_v2  ;;  %3485 = vmatpush3.msra.mxu0 %v1699_v34  ;;  %v2773_v31 = vrot.slane %v4423_v12, %v2772_v30  ;;  %v2865_v12 = vrot.slane %v725_v16, %v1702_v62 }
 0xae8   : > { %3486 = vmatprep.subr.mxu0 %v4014_v2  ;;  %3496 = vmatpush3.msra.mxu1 %v2683_v63 }
 0xae9   : > { %3487 = vmatpush3.msra.mxu0 %v1698_v35  ;;  %3497 = vmatprep.subr.mxu1 %v4014_v2  ;;  %p3233_p10 = scmp.ne.s32.totalorder %s4877_s2, 1 }
 0xaea   : > { %3488 = vmatprep.subr.mxu0 %v4014_v2  ;;  %s4879_s22 = sld [smem:[#allocation45_spill]] (!%p3233_p10) }
 0xaeb   : > { %3489 = vmatpush3.msra.mxu0 %v1697_v36 }
 0xaec   : > { %3490 = vmatprep.subr.mxu0 %v4014_v2 }
 0xaed   : > { %3491 = vmatpush3.msra.mxu0 %v1696_v37 }
 0xaee   : > { %3506 = vmatprep.subr.mxu0 %v4014_v2 }
 0xb45   : > { %v2323_v32 = vpop.f32.mrf.mxu1 }
 0xb47   : > { %v3462_v33 = vpop.f32.mrf.mxu1 }
 0xb9d   : > { %v2402_v38 = vpop.f32.mrf.mxu1 }
 0xb9e   : > { %2565 = vrot.lane.b32.xlu1 %v2402_v38, %s4021_s18 }
 0xb9f   : > { %v3469_v39 = vpop.f32.mrf.mxu1 }
 0xba5   : > { %v2560_v40 = vpop.f32.mrf.mxu1 }
 0xba6   : > { %v2481_v41 = vpop.f32.mrf.mxu0  ;;  %2573 = vrot.lane.b32.xlu1 %v2560_v40, %s4023_s3 }
 0xba7   : > { %2569 = vrot.lane.b32.xlu0 %v2481_v41, %s4022_s4  ;;  %v3483_v42 = vpop.f32.mrf.mxu1 }
 0xba8   : > { %v3476_v43 = vpop.f32.mrf.mxu0 }
 0xc10   : > { %v2566_v45 = vpop.permute.xlu1 %2565 }
 0xc11   : > { %v2576_v46 = vsel %vm933_vm3, %v2323_v32, %v2566_v45 }
 0xc18   : > { %v2574_v48 = vpop.permute.xlu1 %2573 }
 0xc19   : > { %v2570_v47 = vpop.permute.xlu0 %2569 }
 0xc1a   : > { %v2577_v49 = vsel %vm1585_vm4, %v2576_v46, %v2570_v47  ;;  %v2870_v46 = vrot.slane %v725_v16, %v2581_v51 }
 0xc1b   : > { %v2578_v50 = vsel %vm1587_vm5, %v2577_v49, %v2574_v48 }
 0xc1c   : > { %3493 = vmatmul.mubr.msk.f32.vlgmr.msra.gmra.mxu0 %vm739_vm2, %v2578_v50 }
 0xc1d   : > { %3522 = vmatprep.mubr.msk.f32.mxu0 %vm4015_vm1, %v4014_v2  ;;  %3507 = vmatpush3.msra.mxu0 %v2769_v3 }
 0xc1e   : > { %3508 = vmatprep.subr.mxu0 %v4014_v2 }
 0xc1f   : > { %3509 = vmatpush3.msra.mxu0 %v2768_v6 }
 0xc20   : > { %3510 = vmatprep.subr.mxu0 %v4014_v2 }
 0xc21   : > { %3511 = vmatpush3.msra.mxu0 %v2767_v7 }
 0xc22   : > { %3512 = vmatprep.subr.mxu0 %v4014_v2 }
 0xc23   : > { %3513 = vmatpush3.msra.mxu0 %v2766_v8 }
 0xc24   : > { %3514 = vmatprep.subr.mxu0 %v4014_v2 }
 0xc25   : > { %3515 = vmatpush3.msra.mxu0 %v2765_v9 }
 0xc26   : > { %3516 = vmatprep.subr.mxu0 %v4014_v2 }
 0xc27   : > { %3517 = vmatpush3.msra.mxu0 %v2764_v24 }
 0xc28   : > { %3518 = vmatprep.subr.mxu0 %v4014_v2 }
 0xc29   : > { %3519 = vmatpush3.msra.mxu0 %v2763_v5 }
 0xc2a   : > { %3520 = vmatprep.subr.mxu0 %v4014_v2 }
 0xc2b   : > { %3521 = vmatpush3.msra.mxu0 %v2762_v25 }
 0xcdc   : > { %v2652_v53 = vpop.f32.mrf.mxu0 }
 0xcdd   : > { %v2653_v4 = vadd.f32 %v2652_v53, %v2582_v52 }
 0xcde   : > { %v3494_v54 = vpop.f32.mrf.mxu0 }
 0xcdf   : > { %v2656_v55 = vadd.f32 %v2653_v4, %v4551_v18  ;;  %v2682_v18 = vld [vmem:[%s4366_s6 + $0x10] sm:$0xff]  ;;  %s4878_s6 = sld [smem:[#allocation44_spill]] (!%p3233_p10) }
 0xce0   : > { %3498 = vmatpush3.msra.mxu1 %v2682_v18 }
 0xce1   : > { %v2657_v56 = vsel %vm739_vm2, %v2656_v55, 0.0  ;;  %3499 = vmatprep.subr.mxu1 %v4014_v2 }
 0xce2   : > { %2658 = vadd.xlane.f32.xlu0 %v2657_v56  ;;  %3500 = vmatpush3.msra.mxu1 %v2681_v0 }
 0xce3   : > { %3501 = vmatprep.subr.mxu1 %v4014_v2 }
 0xce4   : > { %3502 = vmatpush3.msra.mxu1 %v2680_v1 }
 0xd6b   : > { %v2659_v57 = vpop.xlane.xlu0 %2658 }
 0xd6c   : > { %v2660_v58 = vmul.f32 0.03125, %v2659_v57 }
 0xd6e   : > { %v2661_v59 = vsub.f32 %v2656_v55, %v2660_v58 }
 0xd70   : > { %v2662_v60 = vmul.f32 %v2661_v59, %v2661_v59 }
 0xd72   : > { %v2663_v61 = vsel %vm739_vm2, %v2662_v60, 0.0 }
 0xd73   : > { %2664 = vadd.xlane.f32.xlu1 %v2663_v61 }
 0xdfc   : > { %v2665_v13 = vpop.xlane.xlu1 %2664 }
 0xdfd   : > { %v2666_v14 = vmul.f32 0.03125, %v2665_v13 }
 0xdff   : > { %v2667_v15 = vadd.f32 1e-05, %v2666_v14 }
 0xe01   : > { %3698 = vrsqrt.f32 %v2667_v15 }
 0xe0e   : > { %v3699_v19 = vpop.eup %3698 }
 0xe0f   : > { %v2669_v21 = vmul.f32 %v3699_v19, %v2661_v59 }
 0xe11   : > { %v2674_v22 = vmul.f32 %v2673_v17, %v2669_v21 }
 0xe13   : > { %v2679_v23 = vadd.f32 %v2678_v20, %v2674_v22 }
 0xe15   : > { %3504 = vmatmul.mubr.msk.f32.vlgmr.msra.gmra.mxu1 %vm739_vm2, %v2679_v23 }
 0xed5   : > { %v2757_v44 = vpop.f32.mrf.mxu1 }
 0xed6   : > { %v2758_v27 = vadd.f32 %v2757_v44, %v2687_v26 }
 0xed7   : > { %v3505_v28 = vpop.f32.mrf.mxu1 }
 0xed8   : > { %v2761_v29 = vmax.f32 %v2758_v27, 0.0 }
 0xeda   : > { %3523 = vmatmul.mubr.msk.f32.vlgmr.msra.gmra.mxu0 %vm2774_vm6, %v2761_v29 }
 0xf9a   : > { %v2844_v32 = vpop.f32.mrf.mxu0 }
 0xf9b   : > { %v2845_v33 = vadd.f32 %v2844_v32, %v2773_v31 }
 0xf9c   : > { %v3524_v34 = vpop.f32.mrf.mxu0 }
 0xf9d   : > { %v2848_v2 = vadd.f32 %v2845_v33, %v2679_v23 }
 0xf9f   : > { %v2849_v35 = vsel %vm739_vm2, %v2848_v2, 0.0 }
 0xfa0   : > { %2850 = vadd.xlane.f32.xlu0 %v2849_v35 }
0x1029   : > { %v2851_v36 = vpop.xlane.xlu0 %2850 }
0x102a   : > { %v2852_v37 = vmul.f32 0.03125, %v2851_v36 }
0x102c   : > { %v2853_v38 = vsub.f32 %v2848_v2, %v2852_v37 }
0x102e   : > { %v2854_v39 = vmul.f32 %v2853_v38, %v2853_v38 }
0x1030   : > { %v2855_v40 = vsel %vm739_vm2, %v2854_v39, 0.0 }
0x1031   : > { %2856 = vadd.xlane.f32.xlu0 %v2855_v40 }
0x10ba   : > { %v2857_v41 = vpop.xlane.xlu0 %2856 }
0x10bb   : > { %v2858_v42 = vmul.f32 0.03125, %v2857_v41 }
0x10bd   : > { %v2859_v43 = vadd.f32 1e-05, %v2858_v42 }
0x10bf   : > { %3700 = vrsqrt.f32 %v2859_v43 }
0x10cc   : > { %v3701_v45 = vpop.eup %3700 }
0x10cd   : > { %v2861_v47 = vmul.f32 %v3701_v45, %v2853_v38 }
0x10cf   : > { %v2866_v48 = vmul.f32 %v2865_v12, %v2861_v47  ;;  %2876 = sbr.rel (%p3233_p10) target bundleno = 4617 (0x1209), region = 100 }
0x10d1   : > { %v2871_v49 = vadd.f32 %v2870_v46, %v2866_v48 }
0x10d3   : > { %2872 = vst.msk [vmem:[#allocation2] sm:$0xff] %vm739_vm2, %v2871_v49 }
0x10d4   : > { %v2879_v50 = vsel %vm739_vm2, %v2871_v49, 0.0  ;;  %v3234_v57 = vld [vmem:[%s4878_s6] ss:$0 sm:$0xff] }
0x10d5   : > { %2880 = vadd.xlane.f32.xlu0 %v2879_v50  ;;  %v3235_v59 = vld [vmem:[%s4879_s22] ss:$0 sm:$0xff] }
0x115e   : > { %v2881_v52 = vpop.xlane.xlu0 %2880 }
0x115f   : > { %v2882_v53 = vmul.f32 0.03125, %v2881_v52 }
0x1161   : > { %v2883_v4 = vsub.f32 %v2871_v49, %v2882_v53 }
0x1163   : > { %v2884_v62 = vmul.f32 %v2883_v4, %v2883_v4 }
0x1165   : > { %v2885_v54 = vsel %vm739_vm2, %v2884_v62, 0.0 }
0x1166   : > { %2886 = vadd.xlane.f32.xlu0 %v2885_v54 }
0x11ef   : > { %v2887_v10 = vpop.xlane.xlu0 %2886 }
0x11f0   : > { %v2888_v51 = vmul.f32 0.03125, %v2887_v10 }
0x11f2   : > { %v2889_v55 = vadd.f32 1e-05, %v2888_v51 }
0x11f4   : > { %3702 = vrsqrt.f32 %v2889_v55 }
0x1201   : > { %v3703_v56 = vpop.eup %3702 }
0x1202   : > { %v2891_v58 = vmul.f32 %v3703_v56, %v2883_v4 }
0x1204   : > { %v2898_v60 = vmul.f32 %v3234_v57, %v2891_v58 }
0x1206   : > { %v2905_v61 = vadd.f32 %v3235_v59, %v2898_v60 }
0x1208   : > { %2906 = vst.msk [vmem:[%s691_s12] sm:$0xff] %vm739_vm2, %v2905_v61 }
0x1209 PF: > { %s4880_s0 = sld [smem:[#allocation25_spill]]  ;;  %s2921_s28 = sshll.u32 %s691_s12, 4  ;;  %s2922_s28 = int_to_ptr.vmem [resolvable:$true] %s2921_s28 }
0x120a   : > { %s4881_s8 = sld [smem:[#allocation28_spill]]  ;;  %s2908_s24 = scalar_lea.sflag [#allocation5], %s4339_s5 }
0x120b   : > { %s4882_s7 = sld [smem:[#allocation46_spill]]  ;;  %s3872_s11 = scalar_lea.vmem %s2922_s28, 128 }
0x120c   : > { %p3873_p2 = scmp.ne.s32.totalorder %s2922_s28, %s3872_s11  ;;  %s4024_s23 = smov [#allocation14]  }
0x120d   : > { %s3876_s1 = sshll.u32 %s4024_s23, 4  ;;  %s3877_s1 = int_to_ptr.vmem [resolvable:$false] %s3876_s1 }
0x120e   : > { %s3878_s26 = scalar_lea.vmem %s3877_s1, 256  ;;  %p3879_p1 = scmp.lt.s32.totalorder %s2922_s28, %s3877_s1 }
0x120f   : > { %s3237_s20 = sshll.u32 %s4880_s0, 7  ;;  %p3880_p0 = scmp.lt.s32.totalorder %s3878_s26, %s3872_s11 }
0x1210   : > { %p4883_p7 = scmp.ne.s32.totalorder %s4881_s8, 0 }
0x1211   : > { %s2919_s15 = scalar_lea.hbm %s4882_s7, %s3237_s20  ;;  %p3881_p9 = por %p3880_p0, %p3879_p1 }
0x1212   : > { %p3874_p3 = pnand %p3873_p2, %p4883_p7 }
0x1214   : > { %p3875_p11 = pneg %p3874_p3 }
0x1216   : > { %p3882_p12 = pnand %p3881_p9, %p3875_p11 }
0x1218   : > { %3885 = shalt.err (!%p3882_p12)
}
0x1219   : > { %s3886_s18 = scalar_lea.hbm %s2919_s15, 128  ;;  %s3890_s12 = scalar_lea.hbm %s4882_s7, 256 }
0x121a   : > { %p3887_p5 = scmp.ne.s32.totalorder %s2919_s15, %s3886_s18  ;;  %p3891_p6 = scmp.lt.s32.totalorder %s2919_s15, %s4882_s7 }
0x121b   : > { %p3892_p13 = scmp.lt.s32.totalorder %s3890_s12, %s3886_s18 }
0x121c   : > { %p3888_p8 = pnand %p3887_p5, %p4883_p7 }
0x121d   : > { %p3893_p10 = por %p3892_p13, %p3891_p6 }
0x121e   : > { %p3889_p4 = pneg %p3888_p8 }
0x1220   : > { %p3894_p2 = pnand %p3893_p10, %p3889_p4 }
0x1222   : > { %3897 = shalt.err (!%p3894_p2)
}
0x1223   : > { %3537 = dma.vmem_to_hbm [thread:$0]  (%p4883_p7), %s2922_s28, 128, %s2919_s15, %s2908_s24  }
0x1224 PF: > { %s4884_s2 = sld [smem:[#allocation22_spill]]  ;;  %p3563_p3 = scmp.ge.s32.totalorder %s4004_s13, 2 }
0x1225   : > { %s4885_s27 = sld [smem:[#allocation29_spill]] }
0x122a   : > { %s2933_s16 = sand.u32 1, %s4884_s2  }
0x122b   : > { %p4886_p11 = scmp.ne.s32.totalorder %s4885_s27, 0  ;;  %s2934_s6 = scalar_lea.sflag [#allocation5], %s2933_s16 }
0x122d   : > { %p3559_p1 = pnand %p3563_p3, %p4886_p11 }
0x122f   : > { %p3560_p0 = pneg %p3559_p1 }
0x1231   : > { %3959 = dma.done.wait (%p3560_p0), %s2934_s6, 128  }
0x1232   : > { %3961 = vsyncadd (%p3560_p0), %s2934_s6, 4294967168  ;;  %s37_s13 = sadd.s32 1, %s4004_s13   ;;  %s4887_s21 = sld [smem:[#allocation20_spill]] }
0x1233   : > { %p34_p9 = scmp.ge.s32.totalorder %s37_s13, 6   ;;  %s4888_s22 = sld [smem:[#allocation21_spill]] }
0x1234   : > { %s4889_s23 = sld [smem:[#allocation33_spill]]  ;;  %s4894_s24 = smov %s3980_s25 }
0x1235   : > { %s4890_s17 = sld [smem:[#allocation23_spill]]  ;;  %s4896_s27 = smov %s3996_s29 }
0x1236   : > { %s4891_s26 = sld [smem:[#allocation34_spill]]  ;;  %s4897_s28 = smov %s4000_s30 }
0x1237   : > { %s4892_s10 = sld [smem:[#allocation30_spill]] }
0x1238   : > { %s4893_s0 = sld [smem:[#allocation32_spill]] }
0x123a   :  { %36 = sbr.rel (!%p34_p9) target bundleno = 28 (0x1c), region = 194 }
0x123b   : > { %s4895_s25 = smov %s4890_s17 }
0x123d   : > { %s4898_s29 = smov %s4892_s10 }
0x123e   : > { %s4899_s30 = smov %s4893_s0 }
0x123f   :  { %2939 = vsyncpa [#allocation4], 1 }
0x1240   :  { %2941 = vsyncpa [#allocation4 + $0x1], 1 }
0x1241   :  { %2942 = vsyncpa [#allocation7], 1 }
0x1242   :  { %2944 = vsyncpa [#allocation7 + $0x1], 1 }
0x1243   :  { %2945 = vsyncpa [#allocation10], 1 }
0x1244   :  { %2947 = vsyncpa [#allocation10 + $0x1], 1 }
0x1245   :  { %2948 = vsyncpa [#allocation13], 1 }
0x1246   :  { %2950 = vsyncpa [#allocation13 + $0x1], 1 }
0x1247   :  { %2951 = vsyncpa [#allocation5], 1 }
0x1248   :  { %2953 = vsyncpa [#allocation5 + $0x1], 1 }

</bundles_post_ra>
